<compile_context>
chip_gen: v6e
topology: v6e:2x2x1
jax: 0.10.0
libtpu: 0.0.40
codegen_flags: <defaults>
</compile_context>

<pallas_src>
import functools

import jax
import jax.numpy as jnp
from jax.experimental import pallas as pl
from jax.experimental.pallas import tpu as pltpu


_WEIGHT_ORDER = (
    "ln1_w", "ln1_b",
    "wq", "bq", "wk", "wv", "bv", "wo", "bo",
    "ln2_w", "ln2_b",
    "w1", "b1", "w2", "b2",
)


def _round_up(x, m):
    return (x + m - 1) // m * m


def _layernorm(x, gamma, beta, eps=1e-5):
    # Matches whisper's LayerNorm (computed in float32, eps=1e-5).
    mu = jnp.mean(x, axis=-1, keepdims=True)
    var = jnp.mean((x - mu) ** 2, axis=-1, keepdims=True)
    return (x - mu) * jax.lax.rsqrt(var + eps) * gamma + beta


def residual_attention_block_kernel(
    x_ref,            # (1, T_pad, D)  full (padded) sequence, one block per batch element
    ln1_w_ref, ln1_b_ref,
    wq_ref, bq_ref, wk_ref, wv_ref, bv_ref, wo_ref, bo_ref,
    ln2_w_ref, ln2_b_ref,
    w1_ref, b1_ref, w2_ref, b2_ref,
    o_ref,            # (1, TQ, D)
    k_scratch,        # (T_pad, D) bf16, lane-dense, persists across query tiles
    v_scratch,        # (T_pad, D) bf16, lane-dense
    o_heads_scratch,  # (TQ, D)    f32, per-head attention outputs assembled lane-dense
    *, n_head, q_tile, valid_len,
):
    T_pad = x_ref.shape[1]
    D = x_ref.shape[2]
    d = D // n_head
    bf16 = jnp.bfloat16
    f32 = jnp.float32

    # ---- K / V for the whole (padded) sequence: once per batch element.
    # ---- (Inner grid axis is "arbitrary", so the scratch carries across tiles.)
    @pl.when(pl.program_id(1) == 0)
    def _():
        x_full = x_ref[0].astype(f32)                                   # (T_pad, D)
        h = _layernorm(x_full, ln1_w_ref[...], ln1_b_ref[...]).astype(bf16)
        # Flat lane-dense projections on the full MXU width; the d**-0.25
        # attention scale is pre-folded into wk (and wq / bq) in the wrapper.
        k = jnp.dot(h, wk_ref[...], preferred_element_type=f32)         # (T_pad, D)
        v = jnp.dot(h, wv_ref[...], preferred_element_type=f32) + bv_ref[...]
        k_scratch[...] = k.astype(bf16)
        v_scratch[...] = v.astype(bf16)

    # ---------------- self-attention on this query tile ----------------
    q_start = pl.multiple_of(pl.program_id(1) * q_tile, q_tile)
    x_t = x_ref[0, pl.ds(q_start, q_tile), :].astype(f32)               # (TQ, D)
    h_t = _layernorm(x_t, ln1_w_ref[...], ln1_b_ref[...]).astype(bf16)
    q = (jnp.dot(h_t, wq_ref[...], preferred_element_type=f32)
         + bq_ref[...]).astype(bf16)                                    # (TQ, D)

    if valid_len < T_pad:   # static: zero-padded key rows must not attend
        key_idx = jax.lax.broadcasted_iota(jnp.int32, (1, T_pad), 1)

    # Per-head score / softmax / PV on static lane slices of the flat q / K / V.
    # (The d-deep contraction is inherent to MHA; the big projections above and
    #  the output projection below now run at full MXU width.)
    for hh in range(n_head):
        lo, hi = hh * d, (hh + 1) * d
        s = jnp.einsum("qd,kd->qk", q[:, lo:hi], k_scratch[:, lo:hi],
                       preferred_element_type=f32)                      # (TQ, T_pad)
        if valid_len < T_pad:
            s = jnp.where(key_idx < valid_len, s, -1e30)
        s = s - jnp.max(s, axis=-1, keepdims=True)
        p = jnp.exp(s)
        # approx reciprocal runs on the EUP slot; error is far below tolerance.
        p = p * pl.reciprocal(jnp.sum(p, axis=-1, keepdims=True), approx=True)
        o_heads_scratch[:, lo:hi] = jnp.dot(p.astype(bf16), v_scratch[:, lo:hi],
                                            preferred_element_type=f32)

    # Single full-depth output projection (replaces per-head matmuls + H-way sum).
    attn = jnp.dot(o_heads_scratch[...].astype(bf16), wo_ref[...],
                   preferred_element_type=f32) + bo_ref[...]            # (TQ, D)
    x1 = x_t + attn

    # ---------------- MLP ----------------
    h2 = _layernorm(x1, ln2_w_ref[...], ln2_b_ref[...]).astype(bf16)
    m = jnp.dot(h2, w1_ref[...], preferred_element_type=f32) + b1_ref[...]
    # exact (erf-based) GELU, matching nn.GELU() default; kept in f32.
    m = 0.5 * m * (1.0 + jax.lax.erf(m * 0.7071067811865476))
    y = jnp.dot(m.astype(bf16), w2_ref[...],
                preferred_element_type=f32) + b2_ref[...]

    o_ref[0] = (x1 + y).astype(o_ref.dtype)


def prepare_params(params, n_head, compute_dtype=jnp.bfloat16):
    """One-time wrapper-side layout plumbing: (in, out) bf16 weights, f32
    biases / LN params, d**-0.25 attention scale folded into wq / bq / wk."""
    D = params["wq"].shape[0]
    n_mlp = params["w1"].shape[0]
    d = D // n_head
    scale = float(d) ** (-0.25)
    f32 = jnp.float32
    t = lambda w: jnp.asarray(w, f32).T        # torch Linear (out, in) -> (in, out)
    return {
        "ln1_w": jnp.asarray(params["ln1_w"], f32).reshape(1, D),
        "ln1_b": jnp.asarray(params["ln1_b"], f32).reshape(1, D),
        "wq": (t(params["wq"]) * scale).astype(compute_dtype),      # (D, D)
        "bq": (jnp.asarray(params["bq"], f32) * scale).reshape(1, D),
        "wk": (t(params["wk"]) * scale).astype(compute_dtype),      # key has no bias
        "wv": t(params["wv"]).astype(compute_dtype),
        "bv": jnp.asarray(params["bv"], f32).reshape(1, D),
        "wo": t(params["wo"]).astype(compute_dtype),                # (D, D)
        "bo": jnp.asarray(params["bo"], f32).reshape(1, D),
        "ln2_w": jnp.asarray(params["ln2_w"], f32).reshape(1, D),
        "ln2_b": jnp.asarray(params["ln2_b"], f32).reshape(1, D),
        "w1": t(params["w1"]).astype(compute_dtype),                # (D, 4D)
        "b1": jnp.asarray(params["b1"], f32).reshape(1, n_mlp),
        "w2": t(params["w2"]).astype(compute_dtype),                # (4D, D)
        "b2": jnp.asarray(params["b2"], f32).reshape(1, D),
    }


def _single_buffer_supported():
    """Feature-probe BlockSpec(pipeline_mode=pl.Buffered(1)) (construction only)."""
    if not hasattr(pl, "Buffered"):
        return False
    try:
        pl.BlockSpec((8, 128), lambda i, j: (0, 0), pipeline_mode=pl.Buffered(1))
        return True
    except TypeError:
        return False


def _vmem_limit_bytes(T_pad, q_tile, D, n_mlp, weights, single_buffered):
    weight_bytes = sum(int(w.size) * w.dtype.itemsize for w in weights)
    if not single_buffered:
        weight_bytes *= 2                              # default double-buffering
    io_bytes = 2 * 4 * (T_pad * D + q_tile * D)        # double-buffered x / out blocks (f32)
    scratch_bytes = 2 * T_pad * D * 2 + q_tile * D * 4  # bf16 K/V + f32 per-head out
    act_bytes = 4 * (
        4 * T_pad * D                                  # prologue x / LN(x) / K / V f32 temps
        + 3 * q_tile * T_pad                           # live per-head score / prob slabs
        + 8 * q_tile * D                               # q, attn, x1, misc (TQ, D) temps
        + 2 * q_tile * n_mlp                           # MLP hidden activation
    )
    est = int(1.25 * (weight_bytes + io_bytes + scratch_bytes + act_bytes))
    try:   # cap at ~80% of the physical per-core VMEM (v7x: 64 MiB, v5e/v6e: 128 MiB)
        phys = int(pltpu.get_tpu_info().vmem_capacity_bytes)
    except Exception:
        phys = 64 * 1024 * 1024
    cap = int(0.8 * phys)
    return max(min(est, cap), 32 * 1024 * 1024)


def _build_call(B, T_pad, D, out_dtype, weights, n_head, q_tile, valid_len,
                vmem_limit, single_buffer_weights):
    def w_spec(arr):
        nd = arr.ndim
        index_map = lambda b, t, _nd=nd: (0,) * _nd
        if single_buffer_weights:
            # Constant block index across the whole grid -> one VMEM buffer.
            return pl.BlockSpec(arr.shape, index_map, pipeline_mode=pl.Buffered(1))
        return pl.BlockSpec(arr.shape, index_map)

    in_specs = [pl.BlockSpec((1, T_pad, D), lambda b, t: (b, 0, 0))]  # single x stream
    in_specs += [w_spec(w) for w in weights]
    out_spec = pl.BlockSpec((1, q_tile, D), lambda b, t: (b, t, 0))

    kernel = functools.partial(residual_attention_block_kernel,
                               n_head=n_head, q_tile=q_tile, valid_len=valid_len)
    return pl.pallas_call(
        kernel,
        out_shape=jax.ShapeDtypeStruct((B, T_pad, D), out_dtype),
        grid_spec=pltpu.PrefetchScalarGridSpec(
            num_scalar_prefetch=0,
            grid=(B, T_pad // q_tile),
            in_specs=in_specs,
            out_specs=out_spec,
            scratch_shapes=[
                pltpu.VMEM((T_pad, D), jnp.bfloat16),   # K (scale pre-folded), lane-dense
                pltpu.VMEM((T_pad, D), jnp.bfloat16),   # V, lane-dense
                pltpu.VMEM((q_tile, D), jnp.float32),   # per-head outputs, lane-dense
            ],
        ),
        compiler_params=pltpu.CompilerParams(
            # Batch axis "parallel" (megacore); query-tile axis must stay
            # "arbitrary" so the K/V scratch computed at tile 0 is carried.
            dimension_semantics=("parallel", "arbitrary"),
            vmem_limit_bytes=vmem_limit,
        ),
    )


def residual_attention_block(x, prepared, n_head, q_tile=None):
    """Fused LN -> MHA -> +residual -> LN -> MLP(GELU) -> +residual forward."""
    B, T, D = x.shape
    if q_tile is None:
        # Never default to the full sequence: 128 keeps the (TQ, T) score slab
        # bounded, fills MXU rows and keeps output stores lane-dense.
        q_tile = 128 if T >= 128 else _round_up(T, 8)
    assert q_tile % 8 == 0, "q_tile must be a multiple of 8 (128 recommended)"

    # Host-side zero padding to a whole number of query tiles (with the default
    # q_tile this also makes long sequences a multiple of 128 lanes, e.g.
    # Whisper's 1500 -> 1536); padded keys are masked inside the kernel.
    T_pad = _round_up(T, q_tile)
    x_in = jnp.pad(x, ((0, 0), (0, T_pad - T), (0, 0))) if T_pad != T else x

    weights = [prepared[name] for name in _WEIGHT_ORDER]
    n_mlp = prepared["w1"].shape[1]

    single_buf = _single_buffer_supported()
    vmem_limit = _vmem_limit_bytes(T_pad, q_tile, D, n_mlp, weights, single_buf)

    def run(single_buffer_weights):
        call = _build_call(B, T_pad, D, x.dtype, weights, n_head, q_tile, T,
                           vmem_limit, single_buffer_weights)
        return call(x_in, *weights)

    if single_buf:
        try:
            out = run(True)
        except (TypeError, ValueError, NotImplementedError):
            # Narrow fallback: only "this Pallas build doesn't accept
            # pl.Buffered(1) here" style failures; VMEM OOM / lowering /
            # runtime errors propagate to the caller.
            out = run(False)
    else:
        out = run(False)

    return out[:, :T, :] if T_pad != T else out


def reference_block(x, p, n_head):
    """Pure-JAX (f32) reference reproducing the PyTorch forward semantics."""
    def ln(z, g, b):
        z = z.astype(jnp.float32)
        mu = jnp.mean(z, -1, keepdims=True)
        var = jnp.mean((z - mu) ** 2, -1, keepdims=True)
        return (z - mu) * jax.lax.rsqrt(var + 1e-5) * g + b

    B, T, D = x.shape
    d = D // n_head
    scale = float(d) ** (-0.25)

    h = ln(x, p["ln1_w"], p["ln1_b"])
    q = h @ p["wq"].T + p["bq"]
    k = h @ p["wk"].T
    v = h @ p["wv"].T + p["bv"]
    q = q.reshape(B, T, n_head, d).transpose(0, 2, 1, 3) * scale
    k = k.reshape(B, T, n_head, d).transpose(0, 2, 1, 3) * scale
    v = v.reshape(B, T, n_head, d).transpose(0, 2, 1, 3)
    s = jnp.einsum("bhqd,bhkd->bhqk", q, k)
    w = jax.nn.softmax(s, axis=-1)
    o = jnp.einsum("bhqk,bhkd->bhqd", w, v).transpose(0, 2, 1, 3).reshape(B, T, D)
    x = x + (o @ p["wo"].T + p["bo"])

    h2 = ln(x, p["ln2_w"], p["ln2_b"])
    m = h2 @ p["w1"].T + p["b1"]
    m = 0.5 * m * (1.0 + jax.lax.erf(m / jnp.sqrt(2.0)))
    m = m @ p["w2"].T + p["b2"]
    return x + m


def init_params(key, n_state, n_mlp):
    keys = jax.random.split(key, 15)
    s = 0.05
    rnd = lambda k, shape: s * jax.random.normal(k, shape, jnp.float32)
    return {
        "ln1_w": 1.0 + rnd(keys[0], (n_state,)),
        "ln1_b": rnd(keys[1], (n_state,)),
        "wq": rnd(keys[2], (n_state, n_state)),
        "bq": rnd(keys[3], (n_state,)),
        "wk": rnd(keys[4], (n_state, n_state)),
        "wv": rnd(keys[5], (n_state, n_state)),
        "bv": rnd(keys[6], (n_state,)),
        "wo": rnd(keys[7], (n_state, n_state)),
        "bo": rnd(keys[8], (n_state,)),
        "ln2_w": 1.0 + rnd(keys[9], (n_state,)),
        "ln2_b": rnd(keys[10], (n_state,)),
        "w1": rnd(keys[11], (n_mlp, n_state)),
        "b1": rnd(keys[12], (n_mlp,)),
        "w2": rnd(keys[13], (n_state, n_mlp)),
        "b2": rnd(keys[14], (n_state,)),
    }


if __name__ == "__main__":
    B, T, n_state, n_head = 2, 20, 32, 4
    n_mlp = 4 * n_state
    q_tile = 8   # T padded 20 -> 24, 3 query tiles per sequence: exercises the
                 # K/V scratch carry AND the padded-key masking path.

    key = jax.random.PRNGKey(0)
    kx, kp = jax.random.split(key)
    x = jax.random.normal(kx, (B, T, n_state), jnp.float32)
    params = init_params(kp, n_state, n_mlp)
    prepared = prepare_params(params, n_head)

    out = residual_attention_block(x, prepared, n_head, q_tile=q_tile)
    out = jax.block_until_ready(out)

    ref = reference_block(x, params, n_head)
    assert out.shape == (B, T, n_state) and out.dtype == x.dtype
    max_err = float(jnp.max(jnp.abs(out - ref)))
    # bf16 MXU matmuls with f32 accumulation -> relaxed tolerance vs f32 reference.
    assert jnp.allclose(out, ref, atol=2e-2, rtol=2e-2), (
        f"mismatch vs JAX reference, max abs err = {max_err}")
    print("KERNEL_OK")
</pallas_src>

<mosaic_0001>
module attributes {stable_mosaic.version = 11 : i64} {
  func.func @residual_attention_block_kernel(%arg0: i32, %arg1: i32, %arg2: memref<1x24x32xf32, #tpu.memory_space<vmem>>, %arg3: memref<1x32xf32, #tpu.memory_space<vmem>>, %arg4: memref<1x32xf32, #tpu.memory_space<vmem>>, %arg5: memref<32x32xbf16, #tpu.memory_space<vmem>>, %arg6: memref<1x32xf32, #tpu.memory_space<vmem>>, %arg7: memref<32x32xbf16, #tpu.memory_space<vmem>>, %arg8: memref<32x32xbf16, #tpu.memory_space<vmem>>, %arg9: memref<1x32xf32, #tpu.memory_space<vmem>>, %arg10: memref<32x32xbf16, #tpu.memory_space<vmem>>, %arg11: memref<1x32xf32, #tpu.memory_space<vmem>>, %arg12: memref<1x32xf32, #tpu.memory_space<vmem>>, %arg13: memref<1x32xf32, #tpu.memory_space<vmem>>, %arg14: memref<32x128xbf16, #tpu.memory_space<vmem>>, %arg15: memref<1x128xf32, #tpu.memory_space<vmem>>, %arg16: memref<128x32xbf16, #tpu.memory_space<vmem>>, %arg17: memref<1x32xf32, #tpu.memory_space<vmem>>, %arg18: memref<1x8x32xf32, #tpu.memory_space<vmem>>, %arg19: memref<24x32xbf16, #tpu.memory_space<vmem>>, %arg20: memref<24x32xbf16, #tpu.memory_space<vmem>>, %arg21: memref<8x32xf32, #tpu.memory_space<vmem>>) attributes {dimension_semantics = [#tpu.dimension_semantics<parallel>, #tpu.dimension_semantics<arbitrary>], iteration_bounds = array<i64: 2, 3>, scalar_prefetch = 0 : i64, scratch_operands = 3 : i64, tpu.core_type = #tpu.core_type<tc>, window_params = [{transform_indices = @transform_0, window_bounds = array<i64: 1, 24, 32>}, {pipeline_mode = #tpu.pipeline_mode<synchronous>, transform_indices = @transform_1, window_bounds = array<i64: 1, 32>}, {pipeline_mode = #tpu.pipeline_mode<synchronous>, transform_indices = @transform_2, window_bounds = array<i64: 1, 32>}, {pipeline_mode = #tpu.pipeline_mode<synchronous>, transform_indices = @transform_3, window_bounds = array<i64: 32, 32>}, {pipeline_mode = #tpu.pipeline_mode<synchronous>, transform_indices = @transform_4, window_bounds = array<i64: 1, 32>}, {pipeline_mode = #tpu.pipeline_mode<synchronous>, transform_indices = @transform_5, window_bounds = array<i64: 32, 32>}, {pipeline_mode = #tpu.pipeline_mode<synchronous>, transform_indices = @transform_6, window_bounds = array<i64: 32, 32>}, {pipeline_mode = #tpu.pipeline_mode<synchronous>, transform_indices = @transform_7, window_bounds = array<i64: 1, 32>}, {pipeline_mode = #tpu.pipeline_mode<synchronous>, transform_indices = @transform_8, window_bounds = array<i64: 32, 32>}, {pipeline_mode = #tpu.pipeline_mode<synchronous>, transform_indices = @transform_9, window_bounds = array<i64: 1, 32>}, {pipeline_mode = #tpu.pipeline_mode<synchronous>, transform_indices = @transform_10, window_bounds = array<i64: 1, 32>}, {pipeline_mode = #tpu.pipeline_mode<synchronous>, transform_indices = @transform_11, window_bounds = array<i64: 1, 32>}, {pipeline_mode = #tpu.pipeline_mode<synchronous>, transform_indices = @transform_12, window_bounds = array<i64: 32, 128>}, {pipeline_mode = #tpu.pipeline_mode<synchronous>, transform_indices = @transform_13, window_bounds = array<i64: 1, 128>}, {pipeline_mode = #tpu.pipeline_mode<synchronous>, transform_indices = @transform_14, window_bounds = array<i64: 128, 32>}, {pipeline_mode = #tpu.pipeline_mode<synchronous>, transform_indices = @transform_15, window_bounds = array<i64: 1, 32>}, {transform_indices = @transform_16, window_bounds = array<i64: 1, 8, 32>}]} {
    %c0_i32 = arith.constant 0 : i32
    %0 = arith.cmpi eq, %arg1, %c0_i32 : i32
    %1 = arith.extui %0 : i1 to i32
    %c0_i32_0 = arith.constant 0 : i32
    %2 = arith.cmpi ne, %1, %c0_i32_0 : i32
    scf.if %2 {
      %c0_91 = arith.constant 0 : index
      %c0_92 = arith.constant 0 : index
      %c0_93 = arith.constant 0 : index
      %188 = vector.load %arg2[%c0_91, %c0_92, %c0_93] : memref<1x24x32xf32, #tpu.memory_space<vmem>>, vector<1x24x32xf32>
      %189 = vector.shape_cast %188 : vector<1x24x32xf32> to vector<24x32xf32>
      %c0_94 = arith.constant 0 : index
      %c0_95 = arith.constant 0 : index
      %190 = vector.load %arg3[%c0_94, %c0_95] : memref<1x32xf32, #tpu.memory_space<vmem>>, vector<1x32xf32>
      %c0_96 = arith.constant 0 : index
      %c0_97 = arith.constant 0 : index
      %191 = vector.load %arg4[%c0_96, %c0_97] : memref<1x32xf32, #tpu.memory_space<vmem>>, vector<1x32xf32>
      %cst_98 = arith.constant dense<0.000000e+00> : vector<24xf32>
      %192 = vector.multi_reduction <add>, %189, %cst_98 [1] : vector<24x32xf32> to vector<24xf32>
      %193 = vector.shape_cast %192 : vector<24xf32> to vector<24x1xf32>
      %cst_99 = arith.constant 3.200000e+01 : f32
      %194 = vector.broadcast %cst_99 : f32 to vector<24x1xf32>
      %195 = arith.divf %193, %194 : vector<24x1xf32>
      %196 = vector.broadcast %195 : vector<24x1xf32> to vector<24x32xf32>
      %197 = arith.subf %189, %196 : vector<24x32xf32>
      %198 = arith.mulf %197, %197 : vector<24x32xf32>
      %cst_100 = arith.constant dense<0.000000e+00> : vector<24xf32>
      %199 = vector.multi_reduction <add>, %198, %cst_100 [1] : vector<24x32xf32> to vector<24xf32>
      %200 = vector.shape_cast %199 : vector<24xf32> to vector<24x1xf32>
      %cst_101 = arith.constant 3.200000e+01 : f32
      %201 = vector.broadcast %cst_101 : f32 to vector<24x1xf32>
      %202 = arith.divf %200, %201 : vector<24x1xf32>
      %203 = vector.broadcast %195 : vector<24x1xf32> to vector<24x32xf32>
      %204 = arith.subf %189, %203 : vector<24x32xf32>
      %cst_102 = arith.constant 9.99999974E-6 : f32
      %205 = vector.broadcast %cst_102 : f32 to vector<24x1xf32>
      %206 = arith.addf %202, %205 : vector<24x1xf32>
      %207 = math.rsqrt %206 : vector<24x1xf32>
      %208 = vector.broadcast %207 : vector<24x1xf32> to vector<24x32xf32>
      %209 = arith.mulf %204, %208 : vector<24x32xf32>
      %210 = vector.broadcast %190 : vector<1x32xf32> to vector<24x32xf32>
      %211 = arith.mulf %209, %210 : vector<24x32xf32>
      %212 = vector.broadcast %191 : vector<1x32xf32> to vector<24x32xf32>
      %213 = arith.addf %211, %212 : vector<24x32xf32>
      %214 = arith.truncf %213 : vector<24x32xf32> to vector<24x32xbf16>
      %c0_103 = arith.constant 0 : index
      %c0_104 = arith.constant 0 : index
      %215 = vector.load %arg7[%c0_103, %c0_104] : memref<32x32xbf16, #tpu.memory_space<vmem>>, vector<32x32xbf16>
      %cst_105 = arith.constant dense<0.000000e+00> : vector<24x32xf32>
      %216 = tpu.matmul %214, %215, %cst_105 {dimension_numbers = #tpu.dot_dimension_numbers<[1], [0], [0], [1], [0, 0, 1, 1], [], []>} : vector<24x32xbf16>, vector<32x32xbf16>, vector<24x32xf32> -> vector<24x32xf32>
      %c0_106 = arith.constant 0 : index
      %c0_107 = arith.constant 0 : index
      %217 = vector.load %arg8[%c0_106, %c0_107] : memref<32x32xbf16, #tpu.memory_space<vmem>>, vector<32x32xbf16>
      %cst_108 = arith.constant dense<0.000000e+00> : vector<24x32xf32>
      %218 = tpu.matmul %214, %217, %cst_108 {dimension_numbers = #tpu.dot_dimension_numbers<[1], [0], [0], [1], [0, 0, 1, 1], [], []>} : vector<24x32xbf16>, vector<32x32xbf16>, vector<24x32xf32> -> vector<24x32xf32>
      %c0_109 = arith.constant 0 : index
      %c0_110 = arith.constant 0 : index
      %219 = vector.load %arg9[%c0_109, %c0_110] : memref<1x32xf32, #tpu.memory_space<vmem>>, vector<1x32xf32>
      %220 = vector.broadcast %219 : vector<1x32xf32> to vector<24x32xf32>
      %221 = arith.addf %218, %220 : vector<24x32xf32>
      %222 = arith.truncf %216 : vector<24x32xf32> to vector<24x32xbf16>
      %c0_111 = arith.constant 0 : index
      %c0_112 = arith.constant 0 : index
      %223 = vector.load %arg19[%c0_111, %c0_112] : memref<24x32xbf16, #tpu.memory_space<vmem>>, vector<24x32xbf16>
      tpu.vector_store %arg19[%c0_111, %c0_112], %222 {strides = array<i32>} : memref<24x32xbf16, #tpu.memory_space<vmem>>, vector<24x32xbf16>,
      %224 = arith.truncf %221 : vector<24x32xf32> to vector<24x32xbf16>
      %c0_113 = arith.constant 0 : index
      %c0_114 = arith.constant 0 : index
      %225 = vector.load %arg20[%c0_113, %c0_114] : memref<24x32xbf16, #tpu.memory_space<vmem>>, vector<24x32xbf16>
      tpu.vector_store %arg20[%c0_113, %c0_114], %224 {strides = array<i32>} : memref<24x32xbf16, #tpu.memory_space<vmem>>, vector<24x32xbf16>,
    } else {
    }
    %c8_i32 = arith.constant 8 : i32
    %3 = arith.muli %arg1, %c8_i32 : i32
    %4 = tpu.assume_multiple %3, 8 : i32
    %c0 = arith.constant 0 : index
    %5 = arith.index_cast %4 : i32 to index
    %c0_1 = arith.constant 0 : index
    %6 = vector.load %arg2[%c0, %5, %c0_1] : memref<1x24x32xf32, #tpu.memory_space<vmem>>, vector<1x8x32xf32>
    %7 = vector.shape_cast %6 : vector<1x8x32xf32> to vector<8x32xf32>
    %c0_2 = arith.constant 0 : index
    %c0_3 = arith.constant 0 : index
    %8 = vector.load %arg3[%c0_2, %c0_3] : memref<1x32xf32, #tpu.memory_space<vmem>>, vector<1x32xf32>
    %c0_4 = arith.constant 0 : index
    %c0_5 = arith.constant 0 : index
    %9 = vector.load %arg4[%c0_4, %c0_5] : memref<1x32xf32, #tpu.memory_space<vmem>>, vector<1x32xf32>
    %cst = arith.constant dense<0.000000e+00> : vector<8xf32>
    %10 = vector.multi_reduction <add>, %7, %cst [1] : vector<8x32xf32> to vector<8xf32>
    %11 = vector.shape_cast %10 : vector<8xf32> to vector<8x1xf32>
    %cst_6 = arith.constant 3.200000e+01 : f32
    %12 = vector.broadcast %cst_6 : f32 to vector<8x1xf32>
    %13 = arith.divf %11, %12 : vector<8x1xf32>
    %14 = vector.broadcast %13 : vector<8x1xf32> to vector<8x32xf32>
    %15 = arith.subf %7, %14 : vector<8x32xf32>
    %16 = arith.mulf %15, %15 : vector<8x32xf32>
    %cst_7 = arith.constant dense<0.000000e+00> : vector<8xf32>
    %17 = vector.multi_reduction <add>, %16, %cst_7 [1] : vector<8x32xf32> to vector<8xf32>
    %18 = vector.shape_cast %17 : vector<8xf32> to vector<8x1xf32>
    %cst_8 = arith.constant 3.200000e+01 : f32
    %19 = vector.broadcast %cst_8 : f32 to vector<8x1xf32>
    %20 = arith.divf %18, %19 : vector<8x1xf32>
    %21 = vector.broadcast %13 : vector<8x1xf32> to vector<8x32xf32>
    %22 = arith.subf %7, %21 : vector<8x32xf32>
    %cst_9 = arith.constant 9.99999974E-6 : f32
    %23 = vector.broadcast %cst_9 : f32 to vector<8x1xf32>
    %24 = arith.addf %20, %23 : vector<8x1xf32>
    %25 = math.rsqrt %24 : vector<8x1xf32>
    %26 = vector.broadcast %25 : vector<8x1xf32> to vector<8x32xf32>
    %27 = arith.mulf %22, %26 : vector<8x32xf32>
    %28 = vector.broadcast %8 : vector<1x32xf32> to vector<8x32xf32>
    %29 = arith.mulf %27, %28 : vector<8x32xf32>
    %30 = vector.broadcast %9 : vector<1x32xf32> to vector<8x32xf32>
    %31 = arith.addf %29, %30 : vector<8x32xf32>
    %32 = arith.truncf %31 : vector<8x32xf32> to vector<8x32xbf16>
    %c0_10 = arith.constant 0 : index
    %c0_11 = arith.constant 0 : index
    %33 = vector.load %arg5[%c0_10, %c0_11] : memref<32x32xbf16, #tpu.memory_space<vmem>>, vector<32x32xbf16>
    %cst_12 = arith.constant dense<0.000000e+00> : vector<8x32xf32>
    %34 = tpu.matmul %32, %33, %cst_12 {dimension_numbers = #tpu.dot_dimension_numbers<[1], [0], [0], [1], [0, 0, 1, 1], [], []>} : vector<8x32xbf16>, vector<32x32xbf16>, vector<8x32xf32> -> vector<8x32xf32>
    %c0_13 = arith.constant 0 : index
    %c0_14 = arith.constant 0 : index
    %35 = vector.load %arg6[%c0_13, %c0_14] : memref<1x32xf32, #tpu.memory_space<vmem>>, vector<1x32xf32>
    %36 = vector.broadcast %35 : vector<1x32xf32> to vector<8x32xf32>
    %37 = arith.addf %34, %36 : vector<8x32xf32>
    %38 = arith.truncf %37 : vector<8x32xf32> to vector<8x32xbf16>
    %39 = tpu.iota {dimensions = array<i32: 1>} : vector<1x24xi32>
    %40 = vector.extract_strided_slice %38 {offsets = [0, 0], sizes = [8, 8], strides = [1, 1]} : vector<8x32xbf16> to vector<8x8xbf16>
    %c0_15 = arith.constant 0 : index
    %c0_16 = arith.constant 0 : index
    %41 = vector.load %arg19[%c0_15, %c0_16] : memref<24x32xbf16, #tpu.memory_space<vmem>>, vector<24x8xbf16>
    "tpu.trace_start"() <{level = 10 : i32, message = "qd,kd->qk"}> : () -> ()
    %cst_17 = arith.constant dense<0.000000e+00> : vector<8x24xf32>
    %42 = tpu.matmul %40, %41, %cst_17 {dimension_numbers = #tpu.dot_dimension_numbers<[1], [1], [0], [0], [0, 0, 1, 0], [], []>} : vector<8x8xbf16>, vector<24x8xbf16>, vector<8x24xf32> -> vector<8x24xf32>
    %c20_i32 = arith.constant 20 : i32
    "tpu.trace_stop"() : () -> ()
    %43 = vector.broadcast %c20_i32 : i32 to vector<1x24xi32>
    %44 = arith.cmpi slt, %39, %43 : vector<1x24xi32>
    %cst_18 = arith.constant -1.000000e+30 : f32
    %45 = vector.shape_cast %44 : vector<1x24xi1> to vector<1x24xi1>
    %46 = vector.broadcast %45 : vector<1x24xi1> to vector<8x24xi1>
    %47 = vector.broadcast %cst_18 : f32 to vector<8x24xf32>
    %48 = arith.select %46, %42, %47 : vector<8x24xi1>, vector<8x24xf32>
    %cst_19 = arith.constant dense<0xFF800000> : vector<8xf32>
    %49 = vector.multi_reduction <maximumf>, %48, %cst_19 [1] : vector<8x24xf32> to vector<8xf32>
    %50 = vector.shape_cast %49 : vector<8xf32> to vector<8x1xf32>
    %51 = vector.broadcast %50 : vector<8x1xf32> to vector<8x24xf32>
    %52 = arith.subf %48, %51 : vector<8x24xf32>
    %53 = math.exp %52 : vector<8x24xf32>
    %cst_20 = arith.constant dense<0.000000e+00> : vector<8xf32>
    %54 = vector.multi_reduction <add>, %53, %cst_20 [1] : vector<8x24xf32> to vector<8xf32>
    %55 = vector.shape_cast %54 : vector<8xf32> to vector<8x1xf32>
    %56 = tpu.reciprocal %55 {approx = true} : vector<8x1xf32> -> vector<8x1xf32>
    %57 = vector.broadcast %56 : vector<8x1xf32> to vector<8x24xf32>
    %58 = arith.mulf %53, %57 : vector<8x24xf32>
    %59 = arith.truncf %58 : vector<8x24xf32> to vector<8x24xbf16>
    %c0_21 = arith.constant 0 : index
    %c0_22 = arith.constant 0 : index
    %60 = vector.load %arg20[%c0_21, %c0_22] : memref<24x32xbf16, #tpu.memory_space<vmem>>, vector<24x8xbf16>
    %cst_23 = arith.constant dense<0.000000e+00> : vector<8x8xf32>
    %61 = tpu.matmul %59, %60, %cst_23 {dimension_numbers = #tpu.dot_dimension_numbers<[1], [0], [0], [1], [0, 0, 1, 1], [], []>} : vector<8x24xbf16>, vector<24x8xbf16>, vector<8x8xf32> -> vector<8x8xf32>
    %c0_24 = arith.constant 0 : index
    %c0_25 = arith.constant 0 : index
    %62 = vector.load %arg21[%c0_24, %c0_25] : memref<8x32xf32, #tpu.memory_space<vmem>>, vector<8x8xf32>
    tpu.vector_store %arg21[%c0_24, %c0_25], %61 {strides = array<i32>} : memref<8x32xf32, #tpu.memory_space<vmem>>, vector<8x8xf32>,
    %63 = vector.extract_strided_slice %38 {offsets = [0, 8], sizes = [8, 8], strides = [1, 1]} : vector<8x32xbf16> to vector<8x8xbf16>
    %c0_26 = arith.constant 0 : index
    %c8 = arith.constant 8 : index
    %64 = vector.load %arg19[%c0_26, %c8] : memref<24x32xbf16, #tpu.memory_space<vmem>>, vector<24x8xbf16>
    "tpu.trace_start"() <{level = 10 : i32, message = "qd,kd->qk"}> : () -> ()
    %cst_27 = arith.constant dense<0.000000e+00> : vector<8x24xf32>
    %65 = tpu.matmul %63, %64, %cst_27 {dimension_numbers = #tpu.dot_dimension_numbers<[1], [1], [0], [0], [0, 0, 1, 0], [], []>} : vector<8x8xbf16>, vector<24x8xbf16>, vector<8x24xf32> -> vector<8x24xf32>
    %c20_i32_28 = arith.constant 20 : i32
    "tpu.trace_stop"() : () -> ()
    %66 = vector.broadcast %c20_i32_28 : i32 to vector<1x24xi32>
    %67 = arith.cmpi slt, %39, %66 : vector<1x24xi32>
    %cst_29 = arith.constant -1.000000e+30 : f32
    %68 = vector.shape_cast %67 : vector<1x24xi1> to vector<1x24xi1>
    %69 = vector.broadcast %68 : vector<1x24xi1> to vector<8x24xi1>
    %70 = vector.broadcast %cst_29 : f32 to vector<8x24xf32>
    %71 = arith.select %69, %65, %70 : vector<8x24xi1>, vector<8x24xf32>
    %cst_30 = arith.constant dense<0xFF800000> : vector<8xf32>
    %72 = vector.multi_reduction <maximumf>, %71, %cst_30 [1] : vector<8x24xf32> to vector<8xf32>
    %73 = vector.shape_cast %72 : vector<8xf32> to vector<8x1xf32>
    %74 = vector.broadcast %73 : vector<8x1xf32> to vector<8x24xf32>
    %75 = arith.subf %71, %74 : vector<8x24xf32>
    %76 = math.exp %75 : vector<8x24xf32>
    %cst_31 = arith.constant dense<0.000000e+00> : vector<8xf32>
    %77 = vector.multi_reduction <add>, %76, %cst_31 [1] : vector<8x24xf32> to vector<8xf32>
    %78 = vector.shape_cast %77 : vector<8xf32> to vector<8x1xf32>
    %79 = tpu.reciprocal %78 {approx = true} : vector<8x1xf32> -> vector<8x1xf32>
    %80 = vector.broadcast %79 : vector<8x1xf32> to vector<8x24xf32>
    %81 = arith.mulf %76, %80 : vector<8x24xf32>
    %82 = arith.truncf %81 : vector<8x24xf32> to vector<8x24xbf16>
    %c0_32 = arith.constant 0 : index
    %c8_33 = arith.constant 8 : index
    %83 = vector.load %arg20[%c0_32, %c8_33] : memref<24x32xbf16, #tpu.memory_space<vmem>>, vector<24x8xbf16>
    %cst_34 = arith.constant dense<0.000000e+00> : vector<8x8xf32>
    %84 = tpu.matmul %82, %83, %cst_34 {dimension_numbers = #tpu.dot_dimension_numbers<[1], [0], [0], [1], [0, 0, 1, 1], [], []>} : vector<8x24xbf16>, vector<24x8xbf16>, vector<8x8xf32> -> vector<8x8xf32>
    %c0_35 = arith.constant 0 : index
    %c8_36 = arith.constant 8 : index
    %85 = vector.load %arg21[%c0_35, %c8_36] : memref<8x32xf32, #tpu.memory_space<vmem>>, vector<8x8xf32>
    tpu.vector_store %arg21[%c0_35, %c8_36], %84 {strides = array<i32>} : memref<8x32xf32, #tpu.memory_space<vmem>>, vector<8x8xf32>,
    %86 = vector.extract_strided_slice %38 {offsets = [0, 16], sizes = [8, 8], strides = [1, 1]} : vector<8x32xbf16> to vector<8x8xbf16>
    %c0_37 = arith.constant 0 : index
    %c16 = arith.constant 16 : index
    %87 = vector.load %arg19[%c0_37, %c16] : memref<24x32xbf16, #tpu.memory_space<vmem>>, vector<24x8xbf16>
    "tpu.trace_start"() <{level = 10 : i32, message = "qd,kd->qk"}> : () -> ()
    %cst_38 = arith.constant dense<0.000000e+00> : vector<8x24xf32>
    %88 = tpu.matmul %86, %87, %cst_38 {dimension_numbers = #tpu.dot_dimension_numbers<[1], [1], [0], [0], [0, 0, 1, 0], [], []>} : vector<8x8xbf16>, vector<24x8xbf16>, vector<8x24xf32> -> vector<8x24xf32>
    %c20_i32_39 = arith.constant 20 : i32
    "tpu.trace_stop"() : () -> ()
    %89 = vector.broadcast %c20_i32_39 : i32 to vector<1x24xi32>
    %90 = arith.cmpi slt, %39, %89 : vector<1x24xi32>
    %cst_40 = arith.constant -1.000000e+30 : f32
    %91 = vector.shape_cast %90 : vector<1x24xi1> to vector<1x24xi1>
    %92 = vector.broadcast %91 : vector<1x24xi1> to vector<8x24xi1>
    %93 = vector.broadcast %cst_40 : f32 to vector<8x24xf32>
    %94 = arith.select %92, %88, %93 : vector<8x24xi1>, vector<8x24xf32>
    %cst_41 = arith.constant dense<0xFF800000> : vector<8xf32>
    %95 = vector.multi_reduction <maximumf>, %94, %cst_41 [1] : vector<8x24xf32> to vector<8xf32>
    %96 = vector.shape_cast %95 : vector<8xf32> to vector<8x1xf32>
    %97 = vector.broadcast %96 : vector<8x1xf32> to vector<8x24xf32>
    %98 = arith.subf %94, %97 : vector<8x24xf32>
    %99 = math.exp %98 : vector<8x24xf32>
    %cst_42 = arith.constant dense<0.000000e+00> : vector<8xf32>
    %100 = vector.multi_reduction <add>, %99, %cst_42 [1] : vector<8x24xf32> to vector<8xf32>
    %101 = vector.shape_cast %100 : vector<8xf32> to vector<8x1xf32>
    %102 = tpu.reciprocal %101 {approx = true} : vector<8x1xf32> -> vector<8x1xf32>
    %103 = vector.broadcast %102 : vector<8x1xf32> to vector<8x24xf32>
    %104 = arith.mulf %99, %103 : vector<8x24xf32>
    %105 = arith.truncf %104 : vector<8x24xf32> to vector<8x24xbf16>
    %c0_43 = arith.constant 0 : index
    %c16_44 = arith.constant 16 : index
    %106 = vector.load %arg20[%c0_43, %c16_44] : memref<24x32xbf16, #tpu.memory_space<vmem>>, vector<24x8xbf16>
    %cst_45 = arith.constant dense<0.000000e+00> : vector<8x8xf32>
    %107 = tpu.matmul %105, %106, %cst_45 {dimension_numbers = #tpu.dot_dimension_numbers<[1], [0], [0], [1], [0, 0, 1, 1], [], []>} : vector<8x24xbf16>, vector<24x8xbf16>, vector<8x8xf32> -> vector<8x8xf32>
    %c0_46 = arith.constant 0 : index
    %c16_47 = arith.constant 16 : index
    %108 = vector.load %arg21[%c0_46, %c16_47] : memref<8x32xf32, #tpu.memory_space<vmem>>, vector<8x8xf32>
    tpu.vector_store %arg21[%c0_46, %c16_47], %107 {strides = array<i32>} : memref<8x32xf32, #tpu.memory_space<vmem>>, vector<8x8xf32>,
    %109 = vector.extract_strided_slice %38 {offsets = [0, 24], sizes = [8, 8], strides = [1, 1]} : vector<8x32xbf16> to vector<8x8xbf16>
    %c0_48 = arith.constant 0 : index
    %c24 = arith.constant 24 : index
    %110 = vector.load %arg19[%c0_48, %c24] : memref<24x32xbf16, #tpu.memory_space<vmem>>, vector<24x8xbf16>
    "tpu.trace_start"() <{level = 10 : i32, message = "qd,kd->qk"}> : () -> ()
    %cst_49 = arith.constant dense<0.000000e+00> : vector<8x24xf32>
    %111 = tpu.matmul %109, %110, %cst_49 {dimension_numbers = #tpu.dot_dimension_numbers<[1], [1], [0], [0], [0, 0, 1, 0], [], []>} : vector<8x8xbf16>, vector<24x8xbf16>, vector<8x24xf32> -> vector<8x24xf32>
    %c20_i32_50 = arith.constant 20 : i32
    "tpu.trace_stop"() : () -> ()
    %112 = vector.broadcast %c20_i32_50 : i32 to vector<1x24xi32>
    %113 = arith.cmpi slt, %39, %112 : vector<1x24xi32>
    %cst_51 = arith.constant -1.000000e+30 : f32
    %114 = vector.shape_cast %113 : vector<1x24xi1> to vector<1x24xi1>
    %115 = vector.broadcast %114 : vector<1x24xi1> to vector<8x24xi1>
    %116 = vector.broadcast %cst_51 : f32 to vector<8x24xf32>
    %117 = arith.select %115, %111, %116 : vector<8x24xi1>, vector<8x24xf32>
    %cst_52 = arith.constant dense<0xFF800000> : vector<8xf32>
    %118 = vector.multi_reduction <maximumf>, %117, %cst_52 [1] : vector<8x24xf32> to vector<8xf32>
    %119 = vector.shape_cast %118 : vector<8xf32> to vector<8x1xf32>
    %120 = vector.broadcast %119 : vector<8x1xf32> to vector<8x24xf32>
    %121 = arith.subf %117, %120 : vector<8x24xf32>
    %122 = math.exp %121 : vector<8x24xf32>
    %cst_53 = arith.constant dense<0.000000e+00> : vector<8xf32>
    %123 = vector.multi_reduction <add>, %122, %cst_53 [1] : vector<8x24xf32> to vector<8xf32>
    %124 = vector.shape_cast %123 : vector<8xf32> to vector<8x1xf32>
    %125 = tpu.reciprocal %124 {approx = true} : vector<8x1xf32> -> vector<8x1xf32>
    %126 = vector.broadcast %125 : vector<8x1xf32> to vector<8x24xf32>
    %127 = arith.mulf %122, %126 : vector<8x24xf32>
    %128 = arith.truncf %127 : vector<8x24xf32> to vector<8x24xbf16>
    %c0_54 = arith.constant 0 : index
    %c24_55 = arith.constant 24 : index
    %129 = vector.load %arg20[%c0_54, %c24_55] : memref<24x32xbf16, #tpu.memory_space<vmem>>, vector<24x8xbf16>
    %cst_56 = arith.constant dense<0.000000e+00> : vector<8x8xf32>
    %130 = tpu.matmul %128, %129, %cst_56 {dimension_numbers = #tpu.dot_dimension_numbers<[1], [0], [0], [1], [0, 0, 1, 1], [], []>} : vector<8x24xbf16>, vector<24x8xbf16>, vector<8x8xf32> -> vector<8x8xf32>
    %c0_57 = arith.constant 0 : index
    %c24_58 = arith.constant 24 : index
    %131 = vector.load %arg21[%c0_57, %c24_58] : memref<8x32xf32, #tpu.memory_space<vmem>>, vector<8x8xf32>
    tpu.vector_store %arg21[%c0_57, %c24_58], %130 {strides = array<i32>} : memref<8x32xf32, #tpu.memory_space<vmem>>, vector<8x8xf32>,
    %c0_59 = arith.constant 0 : index
    %c0_60 = arith.constant 0 : index
    %132 = vector.load %arg21[%c0_59, %c0_60] : memref<8x32xf32, #tpu.memory_space<vmem>>, vector<8x32xf32>
    %133 = arith.truncf %132 : vector<8x32xf32> to vector<8x32xbf16>
    %c0_61 = arith.constant 0 : index
    %c0_62 = arith.constant 0 : index
    %134 = vector.load %arg10[%c0_61, %c0_62] : memref<32x32xbf16, #tpu.memory_space<vmem>>, vector<32x32xbf16>
    %cst_63 = arith.constant dense<0.000000e+00> : vector<8x32xf32>
    %135 = tpu.matmul %133, %134, %cst_63 {dimension_numbers = #tpu.dot_dimension_numbers<[1], [0], [0], [1], [0, 0, 1, 1], [], []>} : vector<8x32xbf16>, vector<32x32xbf16>, vector<8x32xf32> -> vector<8x32xf32>
    %c0_64 = arith.constant 0 : index
    %c0_65 = arith.constant 0 : index
    %136 = vector.load %arg11[%c0_64, %c0_65] : memref<1x32xf32, #tpu.memory_space<vmem>>, vector<1x32xf32>
    %137 = vector.broadcast %136 : vector<1x32xf32> to vector<8x32xf32>
    %138 = arith.addf %135, %137 : vector<8x32xf32>
    %139 = arith.addf %7, %138 : vector<8x32xf32>
    %c0_66 = arith.constant 0 : index
    %c0_67 = arith.constant 0 : index
    %140 = vector.load %arg12[%c0_66, %c0_67] : memref<1x32xf32, #tpu.memory_space<vmem>>, vector<1x32xf32>
    %c0_68 = arith.constant 0 : index
    %c0_69 = arith.constant 0 : index
    %141 = vector.load %arg13[%c0_68, %c0_69] : memref<1x32xf32, #tpu.memory_space<vmem>>, vector<1x32xf32>
    %cst_70 = arith.constant dense<0.000000e+00> : vector<8xf32>
    %142 = vector.multi_reduction <add>, %139, %cst_70 [1] : vector<8x32xf32> to vector<8xf32>
    %143 = vector.shape_cast %142 : vector<8xf32> to vector<8x1xf32>
    %cst_71 = arith.constant 3.200000e+01 : f32
    %144 = vector.broadcast %cst_71 : f32 to vector<8x1xf32>
    %145 = arith.divf %143, %144 : vector<8x1xf32>
    %146 = vector.broadcast %145 : vector<8x1xf32> to vector<8x32xf32>
    %147 = arith.subf %139, %146 : vector<8x32xf32>
    %148 = arith.mulf %147, %147 : vector<8x32xf32>
    %cst_72 = arith.constant dense<0.000000e+00> : vector<8xf32>
    %149 = vector.multi_reduction <add>, %148, %cst_72 [1] : vector<8x32xf32> to vector<8xf32>
    %150 = vector.shape_cast %149 : vector<8xf32> to vector<8x1xf32>
    %cst_73 = arith.constant 3.200000e+01 : f32
    %151 = vector.broadcast %cst_73 : f32 to vector<8x1xf32>
    %152 = arith.divf %150, %151 : vector<8x1xf32>
    %153 = vector.broadcast %145 : vector<8x1xf32> to vector<8x32xf32>
    %154 = arith.subf %139, %153 : vector<8x32xf32>
    %cst_74 = arith.constant 9.99999974E-6 : f32
    %155 = vector.broadcast %cst_74 : f32 to vector<8x1xf32>
    %156 = arith.addf %152, %155 : vector<8x1xf32>
    %157 = math.rsqrt %156 : vector<8x1xf32>
    %158 = vector.broadcast %157 : vector<8x1xf32> to vector<8x32xf32>
    %159 = arith.mulf %154, %158 : vector<8x32xf32>
    %160 = vector.broadcast %140 : vector<1x32xf32> to vector<8x32xf32>
    %161 = arith.mulf %159, %160 : vector<8x32xf32>
    %162 = vector.broadcast %141 : vector<1x32xf32> to vector<8x32xf32>
    %163 = arith.addf %161, %162 : vector<8x32xf32>
    %164 = arith.truncf %163 : vector<8x32xf32> to vector<8x32xbf16>
    %c0_75 = arith.constant 0 : index
    %c0_76 = arith.constant 0 : index
    %165 = vector.load %arg14[%c0_75, %c0_76] : memref<32x128xbf16, #tpu.memory_space<vmem>>, vector<32x128xbf16>
    %cst_77 = arith.constant dense<0.000000e+00> : vector<8x128xf32>
    %166 = tpu.matmul %164, %165, %cst_77 {dimension_numbers = #tpu.dot_dimension_numbers<[1], [0], [0], [1], [0, 0, 1, 1], [], []>} : vector<8x32xbf16>, vector<32x128xbf16>, vector<8x128xf32> -> vector<8x128xf32>
    %c0_78 = arith.constant 0 : index
    %c0_79 = arith.constant 0 : index
    %167 = vector.load %arg15[%c0_78, %c0_79] : memref<1x128xf32, #tpu.memory_space<vmem>>, vector<1x128xf32>
    %168 = vector.broadcast %167 : vector<1x128xf32> to vector<8x128xf32>
    %169 = arith.addf %166, %168 : vector<8x128xf32>
    %cst_80 = arith.constant 5.000000e-01 : f32
    %170 = vector.broadcast %cst_80 : f32 to vector<8x128xf32>
    %171 = arith.mulf %170, %169 : vector<8x128xf32>
    %cst_81 = arith.constant 0.707106769 : f32
    %172 = vector.broadcast %cst_81 : f32 to vector<8x128xf32>
    %173 = arith.mulf %169, %172 : vector<8x128xf32>
    %174 = math.erf %173 : vector<8x128xf32>
    %cst_82 = arith.constant 1.000000e+00 : f32
    %175 = vector.broadcast %cst_82 : f32 to vector<8x128xf32>
    %176 = arith.addf %175, %174 : vector<8x128xf32>
    %177 = arith.mulf %171, %176 : vector<8x128xf32>
    %178 = arith.truncf %177 : vector<8x128xf32> to vector<8x128xbf16>
    %c0_83 = arith.constant 0 : index
    %c0_84 = arith.constant 0 : index
    %179 = vector.load %arg16[%c0_83, %c0_84] : memref<128x32xbf16, #tpu.memory_space<vmem>>, vector<128x32xbf16>
    %cst_85 = arith.constant dense<0.000000e+00> : vector<8x32xf32>
    %180 = tpu.matmul %178, %179, %cst_85 {dimension_numbers = #tpu.dot_dimension_numbers<[1], [0], [0], [1], [0, 0, 1, 1], [], []>} : vector<8x128xbf16>, vector<128x32xbf16>, vector<8x32xf32> -> vector<8x32xf32>
    %c0_86 = arith.constant 0 : index
    %c0_87 = arith.constant 0 : index
    %181 = vector.load %arg17[%c0_86, %c0_87] : memref<1x32xf32, #tpu.memory_space<vmem>>, vector<1x32xf32>
    %182 = vector.broadcast %181 : vector<1x32xf32> to vector<8x32xf32>
    %183 = arith.addf %180, %182 : vector<8x32xf32>
    %184 = arith.addf %139, %183 : vector<8x32xf32>
    %c0_88 = arith.constant 0 : index
    %c0_89 = arith.constant 0 : index
    %c0_90 = arith.constant 0 : index
    %185 = vector.load %arg18[%c0_88, %c0_89, %c0_90] : memref<1x8x32xf32, #tpu.memory_space<vmem>>, vector<1x8x32xf32>
    %186 = vector.shape_cast %185 : vector<1x8x32xf32> to vector<8x32xf32>
    %187 = vector.shape_cast %184 : vector<8x32xf32> to vector<1x8x32xf32>
    tpu.vector_store %arg18[%c0_88, %c0_89, %c0_90], %187 {strides = array<i32>} : memref<1x8x32xf32, #tpu.memory_space<vmem>>, vector<1x8x32xf32>,
    return
  }
  func.func @transform_0(%arg0: i32, %arg1: i32) -> (i32, i32, i32) {
    %c0_i32 = arith.constant 0 : i32
    %c0_i32_0 = arith.constant 0 : i32
    %c0_i32_1 = arith.constant 0 : i32
    return %arg0, %c0_i32, %c0_i32_0 : i32, i32, i32
  }
  func.func @transform_1(%arg0: i32, %arg1: i32) -> (i32, i32) {
    %c0_i32 = arith.constant 0 : i32
    %c0_i32_0 = arith.constant 0 : i32
    %c0_i32_1 = arith.constant 0 : i32
    return %c0_i32, %c0_i32_0 : i32, i32
  }
  func.func @transform_2(%arg0: i32, %arg1: i32) -> (i32, i32) {
    %c0_i32 = arith.constant 0 : i32
    %c0_i32_0 = arith.constant 0 : i32
    %c0_i32_1 = arith.constant 0 : i32
    return %c0_i32, %c0_i32_0 : i32, i32
  }
  func.func @transform_3(%arg0: i32, %arg1: i32) -> (i32, i32) {
    %c0_i32 = arith.constant 0 : i32
    %c0_i32_0 = arith.constant 0 : i32
    %c0_i32_1 = arith.constant 0 : i32
    return %c0_i32, %c0_i32_0 : i32, i32
  }
  func.func @transform_4(%arg0: i32, %arg1: i32) -> (i32, i32) {
    %c0_i32 = arith.constant 0 : i32
    %c0_i32_0 = arith.constant 0 : i32
    %c0_i32_1 = arith.constant 0 : i32
    return %c0_i32, %c0_i32_0 : i32, i32
  }
  func.func @transform_5(%arg0: i32, %arg1: i32) -> (i32, i32) {
    %c0_i32 = arith.constant 0 : i32
    %c0_i32_0 = arith.constant 0 : i32
    %c0_i32_1 = arith.constant 0 : i32
    return %c0_i32, %c0_i32_0 : i32, i32
  }
  func.func @transform_6(%arg0: i32, %arg1: i32) -> (i32, i32) {
    %c0_i32 = arith.constant 0 : i32
    %c0_i32_0 = arith.constant 0 : i32
    %c0_i32_1 = arith.constant 0 : i32
    return %c0_i32, %c0_i32_0 : i32, i32
  }
  func.func @transform_7(%arg0: i32, %arg1: i32) -> (i32, i32) {
    %c0_i32 = arith.constant 0 : i32
    %c0_i32_0 = arith.constant 0 : i32
    %c0_i32_1 = arith.constant 0 : i32
    return %c0_i32, %c0_i32_0 : i32, i32
  }
  func.func @transform_8(%arg0: i32, %arg1: i32) -> (i32, i32) {
    %c0_i32 = arith.constant 0 : i32
    %c0_i32_0 = arith.constant 0 : i32
    %c0_i32_1 = arith.constant 0 : i32
    return %c0_i32, %c0_i32_0 : i32, i32
  }
  func.func @transform_9(%arg0: i32, %arg1: i32) -> (i32, i32) {
    %c0_i32 = arith.constant 0 : i32
    %c0_i32_0 = arith.constant 0 : i32
    %c0_i32_1 = arith.constant 0 : i32
    return %c0_i32, %c0_i32_0 : i32, i32
  }
  func.func @transform_10(%arg0: i32, %arg1: i32) -> (i32, i32) {
    %c0_i32 = arith.constant 0 : i32
    %c0_i32_0 = arith.constant 0 : i32
    %c0_i32_1 = arith.constant 0 : i32
    return %c0_i32, %c0_i32_0 : i32, i32
  }
  func.func @transform_11(%arg0: i32, %arg1: i32) -> (i32, i32) {
    %c0_i32 = arith.constant 0 : i32
    %c0_i32_0 = arith.constant 0 : i32
    %c0_i32_1 = arith.constant 0 : i32
    return %c0_i32, %c0_i32_0 : i32, i32
  }
  func.func @transform_12(%arg0: i32, %arg1: i32) -> (i32, i32) {
    %c0_i32 = arith.constant 0 : i32
    %c0_i32_0 = arith.constant 0 : i32
    %c0_i32_1 = arith.constant 0 : i32
    return %c0_i32, %c0_i32_0 : i32, i32
  }
  func.func @transform_13(%arg0: i32, %arg1: i32) -> (i32, i32) {
    %c0_i32 = arith.constant 0 : i32
    %c0_i32_0 = arith.constant 0 : i32
    %c0_i32_1 = arith.constant 0 : i32
    return %c0_i32, %c0_i32_0 : i32, i32
  }
  func.func @transform_14(%arg0: i32, %arg1: i32) -> (i32, i32) {
    %c0_i32 = arith.constant 0 : i32
    %c0_i32_0 = arith.constant 0 : i32
    %c0_i32_1 = arith.constant 0 : i32
    return %c0_i32, %c0_i32_0 : i32, i32
  }
  func.func @transform_15(%arg0: i32, %arg1: i32) -> (i32, i32) {
    %c0_i32 = arith.constant 0 : i32
    %c0_i32_0 = arith.constant 0 : i32
    %c0_i32_1 = arith.constant 0 : i32
    return %c0_i32, %c0_i32_0 : i32, i32
  }
  func.func @transform_16(%arg0: i32, %arg1: i32) -> (i32, i32, i32) {
    %c0_i32 = arith.constant 0 : i32
    %c0_i32_0 = arith.constant 0 : i32
    return %arg0, %arg1, %c0_i32 : i32, i32, i32
  }
}

</mosaic_0001>

<bundles_post_ra>
// kernel: tpu_custom_call.1
= control target key start
LH: loop header
LB: loop body
LE: loop exit
PB: predicated region body
PF: predicated region fallthrough
CT: control target
= control target key end

     0   :  { %s3067_s0 = inlined_call_operand.vmem [shape: f32[2,24,32], index: 0, kind: input, shape index: {}]   ;;  %s3068_s1 = inlined_call_operand.vmem [shape: f32[1,32], index: 1, kind: input, shape index: {}]   ;;  %s3069_s2 = inlined_call_operand.vmem [shape: f32[1,32], index: 2, kind: input, shape index: {}]   ;;  %s3070_s3 = inlined_call_operand.vmem [shape: bf16[32,32], index: 3, kind: input, shape index: {}]   ;;  %s3071_s4 = inlined_call_operand.vmem [shape: f32[1,32], index: 4, kind: input, shape index: {}]   ;;  %s3072_s5 = inlined_call_operand.vmem [shape: bf16[32,32], index: 5, kind: input, shape index: {}]   ;;  %s3073_s6 = inlined_call_operand.hbm [shape: bf16[32,32], index: 6, kind: input, shape index: {}]   ;;  %s3074_s7 = inlined_call_operand.vmem [shape: f32[1,32], index: 7, kind: input, shape index: {}]   ;;  %s3075_s8 = inlined_call_operand.hbm [shape: bf16[32,32], index: 8, kind: input, shape index: {}]   ;;  %s3076_s9 = inlined_call_operand.vmem [shape: f32[1,32], index: 9, kind: input, shape index: {}]   ;;  %s3077_s10 = inlined_call_operand.vmem [shape: f32[1,32], index: 10, kind: input, shape index: {}]   ;;  %s3078_s11 = inlined_call_operand.vmem [shape: f32[1,32], index: 11, kind: input, shape index: {}]   ;;  %s3079_s12 = inlined_call_operand.hbm [shape: bf16[32,128], index: 12, kind: input, shape index: {}]   ;;  %s3080_s13 = inlined_call_operand.vmem [shape: f32[1,128], index: 13, kind: input, shape index: {}]   ;;  %s3081_s14 = inlined_call_operand.vmem [shape: bf16[128,32], index: 14, kind: input, shape index: {}]   ;;  %s3082_s15 = inlined_call_operand.vmem [shape: f32[1,32], index: 15, kind: input, shape index: {}]   ;;  %s3083_s16 = inlined_call_operand.hbm [shape: f32[2,24,32], index: 16, kind: output, shape index: {}]  }
   0x1   :  { %3093 = sst [smem:[#allocation23_spill]] %s3067_s0 }
   0x2   :  { %3094 = sst [smem:[#allocation24_spill]] %s3080_s13 }
   0x3   :  { %3095 = sst [smem:[#allocation25_spill]] %s3082_s15 }
   0x4   :  { %3096 = sst [smem:[#allocation26_spill]] %s3083_s16 }
   0x5   :  { %21 = vsyncpa [#allocation6], 0 }
   0x6   :  { %22 = vsyncpa [#allocation9], 0 }
   0x7   :  { %23 = vsyncpa [#allocation7], 0 }
   0x8   :  { %25 = vsyncpa [#allocation7 + $0x1], 0  ;;  %s2632_s21 = smov 0   ;;  %s2634_s22 = smov 0  }
   0x9   :  { %s2636_s23 = smov 0   ;;  %s2638_s24 = smov 0  }
   0xa   :  { %s2640_s25 = smov 0   ;;  %s2642_s26 = smov 0  }
   0xb   :  { %s2644_s27 = smov 0   ;;  %s2646_s28 = smov 0  }
   0xc LB: > { %3097 = sst [smem:[#allocation15_spill]] %s2503_s21  ;;  %s1912_s29 = sadd.s32 4294967295, %s2531_s28   ;;  %s2531_s28 = sphi %s2646_s28, %s31_s28   ;;  %s2527_s27 = sphi %s2644_s27, %s3123_s27   ;;  %s2523_s26 = sphi %s2642_s26, %s3122_s26   ;;  %s2519_s25 = sphi %s2640_s25, %s3121_s25   ;;  %s2515_s24 = sphi %s2638_s24, %s3120_s24   ;;  %s2511_s23 = sphi %s2636_s23, %s3119_s23   ;;  %s2507_s22 = sphi %s2634_s22, %s3125_s22   ;;  %s2503_s21 = sphi %s2632_s21, %s3124_s21  }
   0xd   : > { %3098 = sst [smem:[#allocation16_spill]] %s2511_s23  ;;  %s1913_s30 = sadd.s32 4294967294, %s2531_s28  }
   0xe   : > { %3099 = sst [smem:[#allocation17_spill]] %s2523_s26  ;;  %s40_s0 = sadd.s32 1, %s2523_s26 }
   0xf   : > { %3100 = sst [smem:[#allocation18_spill]] %s2527_s27  ;;  %s43_s17 = sadd.s32 1, %s2527_s27 }
  0x10   : > { %p41_p0 = scmp.ge.s32.totalorder %s40_s0, 3  ;;  %s393_s18 = sadd.s32 1, %s2511_s23 }
  0x11   : > { %p403_p1 = scmp.ne.s32.totalorder %s2511_s23, %s2507_s22  ;;  %p404_p2 = scmp.eq.s32.totalorder %s1912_s29, 5 }
  0x12   : > { %s3127_s0 = smov (%p41_p0, %s40_s0), 0  ;;  %s3129_s17 = smov (!%p41_p0, %s43_s17), %s2527_s27 }
  0x13   : > { %3101 = sst [smem:[#allocation19_spill]] %s3127_s0  ;;  %s389_s19 = ssub.s32 %s2523_s26, %s3127_s0 }
  0x14   : > { %p2684_p3 = por %p404_p2, %p403_p1  ;;  %p45_p4 = scmp.ge.s32.totalorder %s3129_s17, 2 }
  0x15   : > { %p409_p5 = scmp.ne.s32.totalorder %s2507_s22, %s2503_s21  ;;  %p410_p6 = scmp.eq.s32.totalorder %s1913_s30, 5 }
  0x16   : > { %p1914_p7 = scmp.ge.s32.totalorder %s2531_s28, 1  ;;  %s3131_s17 = smov (%p45_p4, %s3129_s17), 0 }
  0x17   : > { %3103 = sst [smem:[#allocation20_spill]] %s3131_s17  ;;  %p2693_p8 = por %p410_p6, %p409_p5 }
  0x18   : > { %p417_p9 = scmp.lt.s32.totalorder %s2531_s28, 7  ;;  %s388_s15 = ssub.s32 %s2527_s27, %s3131_s17 }
  0x19   : > { %s3104_s16 = scalar_select %p2693_p8, 1, 0 }
  0x1a   : > { %s390_s13 = sor.u32 %s389_s19, %s388_s15  ;;  %p2700_p10 = pnand %p1914_p7, %p417_p9 }
  0x1b   : > { %3105 = sst [smem:[#allocation21_spill]] %s3104_s16  ;;  %p391_p11 = scmp.eq.s32.totalorder %s390_s13, 0 }
  0x1c   : > { %p2704_p12 = scmp.eq.s32.totalorder %s1912_s29, 0  ;;  %p2193_p13 = pneg %p2700_p10 }
  0x1d   : > { %s2711_s30 = scalar_select %p391_p11, %s2511_s23, %s393_s18  }
  0x1e   : > { %p2715_p0 = pnand %p2704_p12, %p2193_p13  ;;  %s2533_s15 = smov [#allocation8]  }
  0x1f   : > { %3108 = sst [smem:[#allocation22_spill]] %s2711_s30  ;;  %s460_s19 = sshll.u32 %s2533_s15, 4  ;;  %s461_s19 = int_to_ptr.vmem [resolvable:$true] %s460_s19 }
  0x20   : > { %p2355_p1 = pneg %p2715_p0  ;;  %s2364_s13 = scalar_lea.vmem %s461_s19, 256 }
  0x21   : > { %p2365_p2 = scmp.ne.s32.totalorder %s461_s19, %s2364_s13  ;;  %p2372_p6 = scmp.lt.s32.totalorder %s461_s19, %s461_s19 }
  0x22   : > { %p2373_p7 = scmp.lt.s32.totalorder %s2364_s13, %s2364_s13 }
  0x23   : > { %p2367_p4 = pnand %p2365_p2, %p2355_p1 }
  0x24   : > { %p2374_p9 = por %p2373_p7, %p2372_p6 }
  0x25   : > { %p2368_p5 = pneg %p2367_p4 }
  0x27   : > { %p2375_p11 = pnand %p2374_p9, %p2368_p5 }
  0x29   : > { %2378 = shalt.err (!%p2375_p11)
}
  0x2a   : > { %s2534_s29 = smov 64   ;;  %s2535_s18 = smov 4  }
  0x2b   : > { %2199 = dma.hbm_to_vmem [thread:$0]  (!%p2715_p0), %s3075_s8, 256, %s461_s19, [#allocation9], %s2534_s29, %s2534_s29, %s2535_s18  }
  0x2c   : > { %s2536_s27 = smov [#allocation5]   ;;  %s2537_s23 = smov [#allocation10]  }
  0x2d   : > { %s444_s30 = sshll.u32 %s2536_s27, 4  ;;  %s482_s21 = sshll.u32 %s2537_s23, 4  ;;  %s445_s30 = int_to_ptr.vmem [resolvable:$true] %s444_s30  ;;  %s483_s21 = int_to_ptr.vmem [resolvable:$true] %s482_s21 }
  0x2e   : > { %s2390_s13 = scalar_lea.vmem %s445_s30, 256  ;;  %p2398_p5 = scmp.lt.s32.totalorder %s445_s30, %s445_s30 }
  0x2f   : > { %p2391_p13 = scmp.ne.s32.totalorder %s445_s30, %s2390_s13  ;;  %p2399_p6 = scmp.lt.s32.totalorder %s2390_s13, %s2390_s13 }
  0x31   : > { %p2393_p2 = pnand %p2391_p13, %p2355_p1  ;;  %p2400_p7 = por %p2399_p6, %p2398_p5 }
  0x33   : > { %p2394_p4 = pneg %p2393_p2 }
  0x35   : > { %p2401_p9 = pnand %p2400_p7, %p2394_p4 }
  0x37   : > { %2404 = shalt.err (!%p2401_p9)
}
  0x38   : > { %2196 = dma.hbm_to_vmem [thread:$0]  (!%p2715_p0), %s3073_s6, 256, %s445_s30, [#allocation6], %s2534_s29, %s2534_s29, %s2535_s18  }
  0x39   : > { %s2416_s17 = scalar_lea.vmem %s483_s21, 256  ;;  %p2424_p8 = scmp.lt.s32.totalorder %s483_s21, %s483_s21 }
  0x3a   : > { %p2417_p11 = scmp.ne.s32.totalorder %s483_s21, %s2416_s17  ;;  %p2425_p5 = scmp.lt.s32.totalorder %s2416_s17, %s2416_s17 }
  0x3c   : > { %p2419_p13 = pnand %p2417_p11, %p2355_p1  ;;  %p2426_p4 = por %p2425_p5, %p2424_p8 }
  0x3e   : > { %p2420_p2 = pneg %p2419_p13 }
  0x40   : > { %p2427_p6 = pnand %p2426_p4, %p2420_p2 }
  0x42   : > { %2430 = shalt.err (!%p2427_p6)
}
  0x43   : > { %2202 = dma.hbm_to_vmem [thread:$0]  (!%p2715_p0), %s3079_s12, 256, %s483_s21, [#allocation9], %s2534_s29, %s2534_s29, %s2535_s18  }
  0x44   : > { %515 = sbr.rel (%p2700_p10) target bundleno = 4450 (0x1162), region = 84 }
  0x49   : > { %2490 = dma.done.wait (%p2704_p12), [#allocation6], 256  }
  0x4a   : > { %2492 = vsyncadd (%p2704_p12), [#allocation6], 4294967040 }
  0x4b   : > { %2494 = dma.done.wait (%p2704_p12), [#allocation9], 512  }
  0x4c   : > { %2496 = vsyncadd (%p2704_p12), [#allocation9], 4294966784  ;;  %s3092_s16 = sand.u32 1, %s2507_s22   ;;  %p573_p8 = scmp.lt.s32.totalorder %s2519_s25, 1 }
  0x4d   : > { %s2768_s21 = sshll.u32 %s3092_s16, 3  ;;  %s3110_s13 = sld [smem:[#allocation23_spill]] }
  0x4e   : > { %s574_s0 = scalar_select %p573_p8, %s2519_s25, 1 }
  0x4f   : > { %s572_s23 = scalar_lea.vmem [#allocation11], %s2768_s21  ;;  %p1925_p10 = scmp.ne.s32.totalorder %s2515_s24, 0 }
  0x50   : > { %s2177_s30 = smul.u32 24, %s574_s0 }
  0x51   : > { %582 = sbr.rel (%p1925_p10) target bundleno = 607 (0x25f), region = 100 }
  0x53   : > { %s2774_s27 = scalar_lea.vmem %s3110_s13, %s2177_s30 }
  0x56   : > { %v583_v0 = vld [vmem:[%s2774_s27] sm:$0xff]  ;;  %vm588_vm0 = vcmask 261120   ;;  %v585_v1 = vld [vmem:[%s2774_s27 + $0x10] sm:$0xff]  ;;  %v584_v2 = vld [vmem:[%s2774_s27 + $0x8] sm:$0xff]  ;;  %vm803_vm1 = vcmask 257024  }
  0x57   : > { %v589_v3 = vsel %vm588_vm0, %v583_v0, 0.0  ;;  %v595_v4 = vsel %vm588_vm0, %v585_v1, 0.0  ;;  %v592_v5 = vsel %vm588_vm0, %v584_v2, 0.0  ;;  %v2291_v21 = vld [vmem:[%s3072_s5 + $0x8] sm:$0xff]   ;;  %v2293_v23 = vld [vmem:[%s3072_s5] sm:$0xff]  }
  0x58   : > { %590 = vadd.xlane.f32.xlu0 %v589_v3  ;;  %596 = vadd.xlane.f32.xlu1 %v595_v4  ;;  %v2292_v22 = vld [vmem:[#allocation5 + $0x8] sm:$0xff]   ;;  %v2294_v24 = vld [vmem:[#allocation5] sm:$0xff]  }
  0x59   : > { %2053 = vmatprep.subr.bf16.mxu0 %v2291_v21  ;;  %2061 = vmatprep.subr.bf16.mxu1 %v2292_v22  ;;  %v1926_v36 = vld [vmem:[%s3068_s1] ss:$0 sm:$0xff] }
  0x5a   : > { %2054 = vmatpush3.bf16.msra.mxu0 %v2291_v21  ;;  %2062 = vmatpush3.bf16.msra.mxu1 %v2292_v22  ;;  %v1927_v42 = vld [vmem:[%s3069_s2] ss:$0 sm:$0xff] }
  0x5b   : > { %2055 = vmatprep.subr.bf16.mxu0 %v2293_v23  ;;  %2063 = vmatprep.subr.bf16.mxu1 %v2294_v24  ;;  %v1932_v50 = vld [vmem:[%s3074_s7] ss:$0 sm:$0xff] }
  0x5c   : > { %593 = vadd.xlane.f32.xlu0 %v592_v5 }
  0x5e   : > { %2056 = vmatpush3.bf16.msra.mxu0 %v2293_v23  ;;  %2064 = vmatpush3.bf16.msra.mxu1 %v2294_v24 }
  0xe1   : > { %v591_v6 = vpop.xlane.xlu0 %590  ;;  %v597_v7 = vpop.xlane.xlu1 %596 }
  0xe2   : > { %v599_v8 = vmul.f32 0.03125, %v591_v6  ;;  %v601_v9 = vmul.f32 0.03125, %v597_v7 }
  0xe4   : > { %v602_v10 = vsub.f32 %v583_v0, %v599_v8  ;;  %v604_v11 = vsub.f32 %v585_v1, %v601_v9 }
  0xe5   : > { %v594_v12 = vpop.xlane.xlu0 %593 }
  0xe6   : > { %v600_v13 = vmul.f32 0.03125, %v594_v12  ;;  %v605_v14 = vmul.f32 %v602_v10, %v602_v10  ;;  %v607_v15 = vmul.f32 %v604_v11, %v604_v11 }
  0xe8   : > { %v603_v16 = vsub.f32 %v584_v2, %v600_v13  ;;  %v608_v17 = vsel %vm588_vm0, %v605_v14, 0.0  ;;  %v614_v18 = vsel %vm588_vm0, %v607_v15, 0.0 }
  0xe9   : > { %609 = vadd.xlane.f32.xlu1 %v608_v17 }
  0xea   : > { %v606_v19 = vmul.f32 %v603_v16, %v603_v16 }
  0xec   : > { %v611_v20 = vsel %vm588_vm0, %v606_v19, 0.0 }
  0xed   : > { %615 = vadd.xlane.f32.xlu1 %v614_v18  ;;  %612 = vadd.xlane.f32.xlu0 %v611_v20 }
 0x172   : > { %v610_v25 = vpop.xlane.xlu1 %609 }
 0x173   : > { %v617_v26 = vmul.f32 0.03125, %v610_v25 }
 0x175   : > { %v620_v27 = vadd.f32 1e-05, %v617_v26 }
 0x176   : > { %v616_v28 = vpop.xlane.xlu1 %615  ;;  %v613_v29 = vpop.xlane.xlu0 %612 }
 0x177   : > { %2295 = vrsqrt.f32 %v620_v27  ;;  %v619_v30 = vmul.f32 0.03125, %v616_v28  ;;  %v618_v31 = vmul.f32 0.03125, %v613_v29 }
 0x179   : > { %v622_v32 = vadd.f32 1e-05, %v619_v30  ;;  %v621_v33 = vadd.f32 1e-05, %v618_v31 }
 0x17b   : > { %2297 = vrsqrt.f32 %v622_v32 }
 0x17c   : > { %2299 = vrsqrt.f32 %v621_v33 }
 0x184   : > { %v2296_v34 = vpop.eup %2295 }
 0x185   : > { %v626_v35 = vmul.f32 %v2296_v34, %v602_v10 }
 0x187   : > { %v635_v41 = vmul.f32 %v1926_v36, %v626_v35 }
 0x188   : > { %v2298_v37 = vpop.eup %2297 }
 0x189   : > { %v2300_v38 = vpop.eup %2299  ;;  %v628_v39 = vmul.f32 %v2298_v37, %v604_v11  ;;  %v644_v46 = vadd.f32 %v1927_v42, %v635_v41 }
 0x18a   : > { %v627_v40 = vmul.f32 %v2300_v38, %v603_v16 }
 0x18b   : > { %v637_v43 = vmul.f32 %v1926_v36, %v628_v39 }
 0x18c   : > { %v636_v44 = vmul.f32 %v1926_v36, %v627_v40 }
 0x18d   : > { %v646_v45 = vadd.f32 %v1927_v42, %v637_v43 }
 0x18e   : > { %v645_v47 = vadd.f32 %v1927_v42, %v636_v44 }
 0x18f   : > { %v648_v48 = vpack.c.bf16 %v646_v45, %v646_v45 }
 0x190   : > { %v647_v49 = vpack.c.bf16 %v645_v47, %v644_v46 }
 0x192   : > { %2057 = vmatprep.mubr.msk.bf16.mxu0 %vm588_vm0, %v647_v49  ;;  %2065 = vmatprep.mubr.msk.bf16.mxu1 %vm588_vm0, %v647_v49 }
 0x193   : > { %2058 = vmatmul.mubr.msk.bf16.vlgmr.msra.gmra.mxu0 %vm588_vm0, %v648_v48  ;;  %2066 = vmatmul.mubr.msk.bf16.vlgmr.msra.gmra.mxu1 %vm588_vm0, %v648_v48 }
 0x253   : > { %v2059_v51 = vpop.f32.mrf.mxu0  ;;  %v2067_v52 = vpop.f32.mrf.mxu1 }
 0x254   : > { %v1999_v53 = vpack.c.bf16 %v2059_v51, %v2059_v51  ;;  %v785_v54 = vadd.f32 %v2067_v52, %v1932_v50 }
 0x255   : > { %v705_v55 = vpop.f32.mrf.mxu0  ;;  %v776_v56 = vpop.f32.mrf.mxu1 }
 0x256   : > { %806 = vst.msk [vmem:[#allocation2 + $0x8] sm:$0xf] %vm803_vm1, %v1999_v53  ;;  %v2002_v57 = vpack.c.bf16 %v785_v54, %v785_v54  ;;  %v1997_v58 = vpack.c.bf16 %v705_v55, %v705_v55  ;;  %v777_v59 = vadd.f32 %v1932_v50, %v776_v56 }
 0x257   : > { %v2060_v60 = vpop.f32.mrf.mxu0  ;;  %v2068_v61 = vpop.f32.mrf.mxu1 }
 0x258   : > { %822 = vst.msk [vmem:[#allocation3 + $0x8] sm:$0xf] %vm803_vm1, %v2002_v57  ;;  %804 = vst.msk [vmem:[#allocation2] sm:$0xf] %vm803_vm1, %v1997_v58  ;;  %v2000_v62 = vpack.c.bf16 %v777_v59, %v777_v59 }
 0x259   : > { %v708_v63 = vpop.f32.mrf.mxu0  ;;  %v779_v0 = vpop.f32.mrf.mxu1 }
 0x25a   : > { %820 = vst.msk [vmem:[#allocation3] sm:$0xf] %vm803_vm1, %v2000_v62  ;;  %v1998_v1 = vpack.c.bf16 %v708_v63, %v708_v63  ;;  %v780_v2 = vadd.f32 %v1932_v50, %v779_v0 }
 0x25c   : > { %805 = vst.msk [vmem:[#allocation2 + $0x4] sm:$0xf] %vm803_vm1, %v1998_v1  ;;  %v2001_v3 = vpack.c.bf16 %v780_v2, %v780_v2 }
 0x25e   : > { %821 = vst.msk [vmem:[#allocation3 + $0x4] sm:$0xf] %vm803_vm1, %v2001_v3 }
 0x25f PF: > { %s1943_s17 = sshll.u32 %s2515_s24, 3  ;;  %vm828_vm2 = vcmask 261120   ;;  %v2301_v11 = vld [vmem:[%s3070_s3 + $0x8] sm:$0xff]   ;;  %v2538_v12 = vmov 0.0   ;;  %vm2539_vm3 = vmmov 0   ;;  %v2302_v13 = vld [vmem:[%s3070_s3] sm:$0xff]   ;;  %v925_v35 = vlaneseq }
 0x260   : > { %s824_s19 = scalar_lea.vmem %s2774_s27, %s1943_s17  ;;  %2069 = vmatprep.subr.bf16.mxu0 %v2538_v12  ;;  %2073 = vmatprep.mubr.msk.bf16.mxu0 %vm2539_vm3, %v2538_v12  ;;  %v1944_v18 = vld [vmem:[%s3068_s1] ss:$0 sm:$0xff]  ;;  %v2303_v22 = vld [vmem:[#allocation2 + $0x8] ss:$0 sps:$4 sm:$0xff]   ;;  %vm938_vm4 = vcmask 64512   ;;  %vm992_vm6 = vcmask 195584  }
 0x261   : > { %v2814_v4 = vld [vmem:[%s824_s19] sm:$0xff]  ;;  %2070 = vmatpush3.bf16.msra.mxu0 %v2301_v11  ;;  %2101 = vmatprep.subr.bf16.mxu1 %v2538_v12  ;;  %v946_v25 = vsel %vm938_vm4, %v2303_v22, 0  ;;  %v2856_v36 = vand.u32 127, %v925_v35  ;;  %v2306_v43 = vld [vmem:[#allocation2 + $0x8] ss:$0 sps:$4 sm:$0xff]   ;;  %s2540_s15 = smov 120  }
 0x262   : > { %v829_v5 = vsel %vm828_vm2, %v2814_v4, 0.0  ;;  %2071 = vmatprep.subr.bf16.mxu0 %v2538_v12  ;;  %2105 = vmatprep.mubr.msk.bf16.mxu1 %vm2539_vm3, %v2538_v12  ;;  %v1945_v20 = vld [vmem:[%s3069_s2] ss:$0 sm:$0xff]  ;;  %v2307_v50 = vld [vmem:[#allocation3 + $0x8] ss:$0 sps:$4 sm:$0xff]   ;;  %vm1020_vm7 = vcmask 1043456  }
 0x263   : > { %830 = vadd.xlane.f32.xlu0 %v829_v5  ;;  %v2304_v26 = vld [vmem:[#allocation2] sm:$0xff]   ;;  %vm988_vm5 = vcmp.lt.s32.totalorder %v2856_v36, 20  ;;  %v1022_v51 = vsel %vm1020_vm7, %v2307_v50, 0  ;;  %s2541_s0 = smov 112   ;;  %s2542_s27 = smov 104   ;;  %vm1211_vm8 = vcmask 130112  }
 0x264   : > { %v943_v27 = vsel %vm938_vm4, %v2304_v26, 0  ;;  %v1946_v28 = vld [vmem:[%s3071_s4] ss:$0 sm:$0xff]  ;;  %s2543_s30 = smov 8   ;;  %s2544_s29 = smov 16   ;;  %vm1358_vm9 = vcmask 195712  }
 0x265   : > { %2072 = vmatpush3.bf16.msra.mxu0 %v2302_v13  ;;  %v2305_v49 = vld [vmem:[#allocation2] sm:$0xff]   ;;  %v2308_v52 = vld [vmem:[#allocation3] sm:$0xff]   ;;  %s2545_s18 = smov 24   ;;  %vm1505_vm10 = vcmask 261312   ;;  %s1807_s26 = sshll.u32 %s572_s23, 4  ;;  %s3012_s26 = int_to_ptr.vmem [resolvable:$true] %s1807_s26 }
 0x266   : > { %2077 = vmatprep.subr.bf16.mxu0 %v2538_v12 }
 0x2ec   : > { %v831_v6 = vpop.xlane.xlu0 %830 }
 0x2ed   : > { %v833_v7 = vmul.f32 0.03125, %v831_v6 }
 0x2ef   : > { %v834_v8 = vsub.f32 %v2814_v4, %v833_v7 }
 0x2f1   : > { %v835_v9 = vmul.f32 %v834_v8, %v834_v8 }
 0x2f3   : > { %v836_v10 = vsel %vm828_vm2, %v835_v9, 0.0  ;;  %v2309_v9 = vld [vmem:[#allocation3] sm:$0xff]  }
 0x2f4   : > { %837 = vadd.xlane.f32.xlu0 %v836_v10  ;;  %v2310_v10 = vld [vmem:[#allocation2 + $0x8] ss:$0 sps:$4 sm:$0xff]  }
 0x30a   : > { %1081 = vrot.lane.b32.xlu0 %v2306_v43, %s2540_s15  ;;  %v2313_v43 = vld [vmem:[#allocation3 + $0x8] ss:$0 sps:$4 sm:$0xff]  }
 0x37d   : > { %v838_v14 = vpop.xlane.xlu0 %837 }
 0x37e   : > { %v839_v15 = vmul.f32 0.03125, %v838_v14 }
 0x380   : > { %v840_v16 = vadd.f32 1e-05, %v839_v15 }
 0x381   : > { %v1082_v55 = vpop.permute.xlu0 %1081 }
 0x382   : > { %2331 = vrsqrt.f32 %v840_v16  ;;  %v1090_v57 = vsel %vm938_vm4, %v1082_v55, 0 }
 0x38f   : > { %v2332_v17 = vpop.eup %2331 }
 0x390   : > { %v842_v19 = vmul.f32 %v2332_v17, %v834_v8  ;;  %v2311_v17 = vld [vmem:[#allocation3 + $0x8] ss:$0 sps:$4 sm:$0xff]  }
 0x392   : > { %v849_v21 = vmul.f32 %v1944_v18, %v842_v19  ;;  %v2312_v18 = vld [vmem:[#allocation2] sm:$0xff]  }
 0x394   : > { %v856_v23 = vadd.f32 %v1945_v20, %v849_v21 }
 0x396   : > { %v857_v24 = vpack.c.bf16 %v856_v23, %v856_v23 }
 0x398   : > { %2074 = vmatmul.mubr.msk.bf16.vlgmr.msra.gmra.mxu0 %vm828_vm2, %v857_v24 }
 0x399   : > { %2078 = vmatpush3.bf16.xpose.msra.mxu0 %v946_v25  ;;  %2081 = vmatprep.mubr.msk.bf16.mxu0 %vm2539_vm3, %v2538_v12 }
 0x39a   : > { %2079 = vmatprep.subr.bf16.mxu0 %v2538_v12 }
 0x3a1   : > { %2080 = vmatpush3.bf16.xpose.msra.mxu0 %v943_v27 }
 0x3a2   : > { %2085 = vmatprep.subr.bf16.mxu0 %v2538_v12 }
 0x458   : > { %v918_v29 = vpop.f32.mrf.mxu0 }
 0x459   : > { %v919_v30 = vadd.f32 %v1946_v28, %v918_v29 }
 0x45a   : > { %v2075_v31 = vpop.f32.mrf.mxu0 }
 0x45b   : > { %v2850_v32 = vpack.c.bf16 %v919_v30, %v919_v30 }
 0x45c   : > { %v921_v33 = vpop.f32.mrf.mxu0 }
 0x45d   : > { %2082 = vmatmul.mubr.msk.bf16.vlgmr.msra.gmra.mxu0 %vm938_vm4, %v2850_v32 }
 0x45e   : > { %v2076_v34 = vpop.f32.mrf.mxu0  ;;  %2089 = vmatprep.mubr.msk.bf16.mxu0 %vm2539_vm3, %v2538_v12  ;;  %2086 = vmatpush3.bf16.msra.mxu0 %v1022_v51 }
 0x45f   : > { %2087 = vmatprep.subr.bf16.mxu0 %v2538_v12 }
 0x462   : > { %2088 = vmatpush3.bf16.msra.mxu0 %v2308_v52  ;;  %v2315_v52 = vld [vmem:[#allocation3] sm:$0xff]  }
 0x463   : > { %2093 = vmatprep.subr.bf16.mxu0 %v2538_v12 }
 0x51d   : > { %v982_v37 = vpop.f32.mrf.mxu0 }
 0x51e   : > { %v991_v38 = vsel %vm988_vm5, %v982_v37, -1e+30 }
 0x51f   : > { %v2083_v39 = vpop.f32.mrf.mxu0  ;;  %v993_v40 = vsel %vm992_vm6, %v991_v38, -inf }
 0x520   : > { %994 = vmax.xlane.f32.xlu1 %v993_v40 }
 0x521   : > { %v985_v41 = vpop.f32.mrf.mxu0 }
 0x523   : > { %v2084_v42 = vpop.f32.mrf.mxu0 }
 0x5a9   : > { %v995_v44 = vpop.xlane.xlu1 %994 }
 0x5aa   : > { %v996_v45 = vsub.f32 %v991_v38, %v995_v44  ;;  %v2314_v44 = vld [vmem:[#allocation2 + $0x8] ss:$0 sps:$4 sm:$0xff]  }
 0x5ac   : > { %v997_v46 = vmul.f32 1.442695, %v996_v45 }
 0x5ae   : > { %2333 = vpow2.f32 %v997_v46 }
 0x5bb   : > { %v2334_v47 = vpop.eup %2333 }
 0x5bc   : > { %v999_v48 = vsel %vm992_vm6, %v2334_v47, 0.0 }
 0x5bd   : > { %1000 = vadd.xlane.f32.xlu1 %v999_v48 }
 0x5ce   : > { %1079 = vrot.lane.b32.xlu1 %v2305_v49, %s2540_s15 }
 0x5d2   : > { %1069 = vrot.lane.b32.xlu1 %v2850_v32, %s2540_s15 }
 0x646   : > { %v1001_v53 = vpop.xlane.xlu1 %1000 }
 0x647   : > { %2335 = vrcp.f32 %v1001_v53  ;;  %v2316_v53 = vld [vmem:[#allocation2] sm:$0xff]  }
 0x64a   : > { %v1080_v59 = vpop.permute.xlu1 %1079 }
 0x64b   : > { %v1087_v60 = vsel %vm938_vm4, %v1080_v59, 0 }
 0x64e   : > { %v1070_v61 = vpop.permute.xlu1 %1069 }
 0x654   : > { %v2336_v54 = vpop.eup %2335 }
 0x655   : > { %v1003_v56 = vmul.f32 %v2336_v54, %v2334_v47 }
 0x657   : > { %v1004_v58 = vpack.c.bf16 %v1003_v56, %v1003_v56 }
 0x659   : > { %2090 = vmatmul.mubr.msk.bf16.vlgmr.msra.gmra.mxu0 %vm992_vm6, %v1004_v58 }
 0x65a   : > { %2094 = vmatpush3.bf16.xpose.msra.mxu0 %v1090_v57  ;;  %2097 = vmatprep.mubr.msk.bf16.mxu0 %vm2539_vm3, %v2538_v12 }
 0x65b   : > { %2095 = vmatprep.subr.bf16.mxu0 %v2538_v12 }
 0x662   : > { %2096 = vmatpush3.bf16.xpose.msra.mxu0 %v1087_v60 }
 0x663   : > { %2117 = vmatprep.subr.bf16.mxu0 %v2538_v12 }
 0x669   : > { %2098 = vmatmul.mubr.msk.bf16.vlgmr.msra.gmra.mxu0 %vm938_vm4, %v1070_v61 }
 0x66a   : > { %2121 = vmatprep.mubr.msk.bf16.mxu0 %vm2539_vm3, %v2538_v12 }
 0x719   : > { %v1058_v62 = vpop.f32.mrf.mxu0 }
 0x71a   : > { %1064 = vst.msk [vmem:[#allocation4] sm:$0xff] %vm938_vm4, %v1058_v62 }
 0x71b   : > { %v2091_v63 = vpop.f32.mrf.mxu0 }
 0x71d   : > { %v1061_v0 = vpop.f32.mrf.mxu0 }
 0x71f   : > { %v2092_v1 = vpop.f32.mrf.mxu0 }
 0x729   : > { %v1126_v2 = vpop.f32.mrf.mxu0 }
 0x72a   : > { %v1132_v3 = vsel %vm988_vm5, %v1126_v2, -1e+30 }
 0x72b   : > { %v2099_v5 = vpop.f32.mrf.mxu0  ;;  %v1133_v6 = vsel %vm992_vm6, %v1132_v3, -inf }
 0x72c   : > { %1134 = vmax.xlane.f32.xlu1 %v1133_v6 }
 0x72d   : > { %v1129_v7 = vpop.f32.mrf.mxu0 }
 0x72f   : > { %v2100_v8 = vpop.f32.mrf.mxu0 }
 0x73d   : > { %1156 = vrot.lane.b32.xlu1 %v2309_v9, %s2540_s15 }
 0x741   : > { %1228 = vrot.lane.b32.xlu1 %v2310_v10, %s2541_s0  ;;  %v2317_v10 = vld [vmem:[#allocation3] sm:$0xff]  }
 0x745   : > { %1216 = vrot.lane.b32.xlu1 %v2850_v32, %s2541_s0 }
 0x7b5   : > { %v1135_v11 = vpop.xlane.xlu1 %1134 }
 0x7b6   : > { %v1136_v13 = vsub.f32 %v1132_v3, %v1135_v11 }
 0x7b8   : > { %v1137_v14 = vmul.f32 1.442695, %v1136_v13 }
 0x7b9   : > { %v1157_v22 = vpop.permute.xlu1 %1156 }
 0x7ba   : > { %2337 = vpow2.f32 %v1137_v14 }
 0x7bd   : > { %v1229_v25 = vpop.permute.xlu1 %1228 }
 0x7be   : > { %v1237_v26 = vsel %vm938_vm4, %v1229_v25, 0 }
 0x7c1   : > { %v1217_v30 = vpop.permute.xlu1 %1216 }
 0x7c7   : > { %v2338_v15 = vpop.eup %2337 }
 0x7c8   : > { %v1139_v16 = vsel %vm992_vm6, %v2338_v15, 0.0 }
 0x7c9   : > { %1140 = vadd.xlane.f32.xlu0 %v1139_v16 }
 0x7df   : > { %1158 = vrot.lane.b32.xlu0 %v2311_v17, %s2540_s15  ;;  %s3111_s15 = sld [smem:[#allocation24_spill]] }
 0x7e3   : > { %1226 = vrot.lane.b32.xlu0 %v2312_v18, %s2541_s0  ;;  %v2318_v18 = vld [vmem:[#allocation3 + $0x8] ss:$0 sps:$4 sm:$0xff]  }
 0x852   : > { %v1141_v19 = vpop.xlane.xlu0 %1140 }
 0x853   : > { %2339 = vrcp.f32 %v1141_v19 }
 0x856   : > { %v1159_v20 = vpop.permute.xlu0 %1158 }
 0x857   : > { %v1165_v21 = vsel %vm1020_vm7, %v1159_v20, 0 }
 0x858   : > { %2102 = vmatpush3.bf16.msra.mxu1 %v1165_v21 }
 0x859   : > { %2103 = vmatprep.subr.bf16.mxu1 %v2538_v12 }
 0x85a   : > { %v1227_v28 = vpop.permute.xlu0 %1226 }
 0x85b   : > { %v1234_v29 = vsel %vm938_vm4, %v1227_v28, 0 }
 0x85c   : > { %2104 = vmatpush3.bf16.msra.mxu1 %v1157_v22 }
 0x85d   : > { %2109 = vmatprep.subr.bf16.mxu1 %v2538_v12 }
 0x860   : > { %v2340_v23 = vpop.eup %2339 }
 0x861   : > { %v1143_v24 = vmul.f32 %v2340_v23, %v2338_v15 }
 0x863   : > { %v1144_v27 = vpack.c.bf16 %v1143_v24, %v1143_v24 }
 0x865   : > { %2106 = vmatmul.mubr.msk.bf16.vlgmr.msra.gmra.mxu1 %vm992_vm6, %v1144_v27  ;;  %v2320_v27 = vld [vmem:[#allocation8] sm:$0xff]  }
 0x866   : > { %2110 = vmatpush3.bf16.xpose.msra.mxu1 %v1237_v26  ;;  %2113 = vmatprep.mubr.msk.bf16.mxu1 %vm2539_vm3, %v2538_v12  ;;  %v2319_v26 = vld [vmem:[#allocation8 + $0x8] sm:$0xff]  }
 0x867   : > { %2111 = vmatprep.subr.bf16.mxu1 %v2538_v12 }
 0x86e   : > { %2112 = vmatpush3.bf16.xpose.msra.mxu1 %v1234_v29 }
 0x86f   : > { %2133 = vmatprep.subr.bf16.mxu1 %v2538_v12 }
 0x875   : > { %2114 = vmatmul.mubr.msk.bf16.vlgmr.msra.gmra.mxu1 %vm938_vm4, %v1217_v30 }
 0x876   : > { %2137 = vmatprep.mubr.msk.bf16.mxu1 %vm2539_vm3, %v2538_v12 }
 0x925   : > { %v2904_v31 = vpop.f32.mrf.mxu1 }
 0x927   : > { %v2107_v33 = vpop.f32.mrf.mxu1 }
 0x929   : > { %v1204_v34 = vpop.f32.mrf.mxu1 }
 0x92b   : > { %v2108_v35 = vpop.f32.mrf.mxu1 }
 0x935   : > { %v1273_v37 = vpop.f32.mrf.mxu1 }
 0x936   : > { %v1279_v38 = vsel %vm988_vm5, %v1273_v37, -1e+30  ;;  %v1974_v37 = vld [vmem:[%s3076_s9] ss:$0 sm:$0xff] }
 0x937   : > { %v2115_v39 = vpop.f32.mrf.mxu1  ;;  %v1280_v40 = vsel %vm992_vm6, %v1279_v38, -inf }
 0x938   : > { %1281 = vmax.xlane.f32.xlu0 %v1280_v40 }
 0x939   : > { %v1276_v41 = vpop.f32.mrf.mxu1 }
 0x93b   : > { %v2116_v42 = vpop.f32.mrf.mxu1 }
 0x94e   : > { %1305 = vrot.lane.b32.xlu0 %v2313_v43, %s2541_s0 }
 0x952   : > { %1375 = vrot.lane.b32.xlu0 %v2314_v44, %s2542_s27 }
 0x956   : > { %1363 = vrot.lane.b32.xlu0 %v2850_v32, %s2542_s27 }
 0x9c1   : > { %v1282_v45 = vpop.xlane.xlu0 %1281 }
 0x9c2   : > { %v1283_v46 = vsub.f32 %v1279_v38, %v1282_v45 }
 0x9c4   : > { %v1284_v47 = vmul.f32 1.442695, %v1283_v46 }
 0x9c5   : > { %v1306_v48 = vpop.permute.xlu0 %1305 }
 0x9c6   : > { %2341 = vpow2.f32 %v1284_v47  ;;  %v1312_v49 = vsel %vm1020_vm7, %v1306_v48, 0 }
 0x9c7   : > { %2118 = vmatpush3.bf16.msra.mxu0 %v1312_v49 }
 0x9c8   : > { %2119 = vmatprep.subr.bf16.mxu0 %v2538_v12 }
 0x9c9   : > { %v1376_v57 = vpop.permute.xlu0 %1375 }
 0x9ca   : > { %v1384_v58 = vsel %vm938_vm4, %v1376_v57, 0 }
 0x9cd   : > { %v1364_v62 = vpop.permute.xlu0 %1363 }
 0x9d3   : > { %v2342_v50 = vpop.eup %2341 }
 0x9d4   : > { %v1286_v51 = vsel %vm992_vm6, %v2342_v50, 0.0 }
 0x9d5   : > { %1287 = vadd.xlane.f32.xlu1 %v1286_v51  ;;  %v2322_v51 = vld [vmem:[#allocation10] sm:$0xff]  }
 0x9e6   : > { %1303 = vrot.lane.b32.xlu1 %v2315_v52, %s2541_s0  ;;  %v2324_v52 = vld [vmem:[%s3081_s14 + $0x30] sm:$0xff]   ;;  %s2178_s0 = smul.u32 3, %s2519_s25 }
 0x9ea   : > { %1373 = vrot.lane.b32.xlu1 %v2316_v53, %s2542_s27 }
 0xa5e   : > { %v1288_v32 = vpop.xlane.xlu1 %1287 }
 0xa5f   : > { %2343 = vrcp.f32 %v1288_v32 }
 0xa62   : > { %v1304_v54 = vpop.permute.xlu1 %1303 }
 0xa63   : > { %2120 = vmatpush3.bf16.msra.mxu0 %v1304_v54 }
 0xa64   : > { %2125 = vmatprep.subr.bf16.mxu0 %v2538_v12 }
 0xa66   : > { %v1374_v60 = vpop.permute.xlu1 %1373 }
 0xa67   : > { %v1381_v61 = vsel %vm938_vm4, %v1374_v60, 0 }
 0xa6c   : > { %v2344_v55 = vpop.eup %2343 }
 0xa6d   : > { %v1290_v56 = vmul.f32 %v2344_v55, %v2342_v50  ;;  %v2321_v50 = vld [vmem:[#allocation10 + $0x8] sm:$0xff]  }
 0xa6f   : > { %v1291_v59 = vpack.c.bf16 %v1290_v56, %v1290_v56  ;;  %v1978_v56 = vld [vmem:[%s3077_s10] ss:$0 sm:$0xff] }
 0xa71   : > { %2122 = vmatmul.mubr.msk.bf16.vlgmr.msra.gmra.mxu0 %vm992_vm6, %v1291_v59 }
 0xa72   : > { %2126 = vmatpush3.bf16.xpose.msra.mxu0 %v1384_v58  ;;  %2129 = vmatprep.mubr.msk.bf16.mxu0 %vm2539_vm3, %v2538_v12  ;;  %v1979_v58 = vld [vmem:[%s3078_s11] ss:$0 sm:$0xff] }
 0xa73   : > { %2127 = vmatprep.subr.bf16.mxu0 %v2538_v12 }
 0xa7a   : > { %2128 = vmatpush3.bf16.xpose.msra.mxu0 %v1381_v61 }
 0xa7b   : > { %2149 = vmatprep.subr.bf16.mxu0 %v2538_v12 }
 0xa81   : > { %2130 = vmatmul.mubr.msk.bf16.vlgmr.msra.gmra.mxu0 %vm938_vm4, %v1364_v62  ;;  %v2325_v62 = vld [vmem:[%s3081_s14 + $0x28] sm:$0xff]  }
 0xa82   : > { %2153 = vmatprep.mubr.msk.bf16.mxu0 %vm2539_vm3, %v2538_v12  ;;  %2150 = vmatpush3.bf16.msra.mxu0 %v2321_v50 }
 0xa83   : > { %2151 = vmatprep.subr.bf16.mxu0 %v2538_v12 }
 0xa86   : > { %2152 = vmatpush3.bf16.msra.mxu0 %v2322_v51 }
 0xb31   : > { %v1348_v63 = vpop.f32.mrf.mxu0 }
 0xb33   : > { %v2123_v0 = vpop.f32.mrf.mxu0 }
 0xb34   : > { %v2327_v0 = vld [vmem:[%s3081_s14 + $0x18] sm:$0xff]  }
 0xb35   : > { %v1351_v1 = vpop.f32.mrf.mxu0 }
 0xb36   : > { %v2328_v1 = vld [vmem:[%s3081_s14 + $0x10] sm:$0xff]  }
 0xb37   : > { %v2124_v2 = vpop.f32.mrf.mxu0 }
 0xb38   : > { %v2329_v2 = vld [vmem:[%s3081_s14 + $0x8] sm:$0xff]  }
 0xb41   : > { %v1420_v3 = vpop.f32.mrf.mxu0 }
 0xb42   : > { %v1426_v5 = vsel %vm988_vm5, %v1420_v3, -1e+30  ;;  %v2330_v3 = vld [vmem:[%s3081_s14] sm:$0xff]  }
 0xb43   : > { %v2131_v6 = vpop.f32.mrf.mxu0  ;;  %v1427_v7 = vsel %vm992_vm6, %v1426_v5, -inf }
 0xb44   : > { %1428 = vmax.xlane.f32.xlu1 %v1427_v7 }
 0xb45   : > { %v1423_v8 = vpop.f32.mrf.mxu0 }
 0xb47   : > { %v2132_v9 = vpop.f32.mrf.mxu0 }
 0xb55   : > { %1450 = vrot.lane.b32.xlu1 %v2317_v10, %s2542_s27 }
 0xb59   : > { %1208 = vrot.lane.b32.xlu1 %v2904_v31, %s2543_s30 }
 0xbcd   : > { %v1429_v11 = vpop.xlane.xlu1 %1428 }
 0xbce   : > { %v1430_v13 = vsub.f32 %v1426_v5, %v1429_v11  ;;  %v1980_v5 = vld [vmem:[%s3111_s15] ss:$0 sm:$0xff]  ;;  %s3113_s15 = sld [smem:[#allocation26_spill]] }
 0xbd0   : > { %v1431_v14 = vmul.f32 1.442695, %v1430_v13 }
 0xbd1   : > { %v1451_v15 = vpop.permute.xlu1 %1450 }
 0xbd2   : > { %2345 = vpow2.f32 %v1431_v14 }
 0xbd5   : > { %v1209_v36 = vpop.permute.xlu1 %1208 }
 0xbd6   : > { %1212 = vst.msk [vmem:[#allocation4] sm:$0xff] %vm1211_vm8, %v1209_v36 }
 0xbdf   : > { %v2346_v16 = vpop.eup %2345 }
 0xbe0   : > { %v1433_v17 = vsel %vm992_vm6, %v2346_v16, 0.0 }
 0xbe1   : > { %1434 = vadd.xlane.f32.xlu0 %v1433_v17 }
 0xbf7   : > { %1452 = vrot.lane.b32.xlu0 %v2318_v18, %s2542_s27  ;;  %s1803_s27 = sadd.s32 %s2515_s24, %s2178_s0  ;;  %s3114_s24 = sand.u32 1, %s2507_s22  }
 0xbf8   : > { %s1994_s13 = sshll.u32 %s1803_s27, 7  ;;  %s1792_s25 = scalar_lea.sflag [#allocation7], %s3114_s24 }
 0xbf9   : > { %s3010_s16 = scalar_lea.hbm %s3113_s15, %s1994_s13  ;;  %s2431_s0 = scalar_lea.vmem %s3012_s26, 128 }
 0xbfa   : > { %p2432_p12 = scmp.ne.s32.totalorder %s3012_s26, %s2431_s0  ;;  %s2546_s27 = smov [#allocation11]  }
 0xbfb   : > { %1355 = vrot.lane.b32.xlu0 %v1348_v63, %s2544_s29  ;;  %v2326_v63 = vld [vmem:[%s3081_s14 + $0x20] sm:$0xff]   ;;  %s2435_s30 = sshll.u32 %s2546_s27, 4  ;;  %s2436_s30 = int_to_ptr.vmem [resolvable:$false] %s2435_s30 }
 0xbfc   : > { %p2433_p0 = pnand %p2432_p12, %p2684_p3  ;;  %s2437_s29 = scalar_lea.vmem %s2436_s30, 256 }
 0xbfd   : > { %p2438_p7 = scmp.lt.s32.totalorder %s3012_s26, %s2436_s30  ;;  %p2439_p9 = scmp.lt.s32.totalorder %s2437_s29, %s2431_s0 }
 0xbfe   : > { %p2434_p1 = pneg %p2433_p0 }
 0xbff   : > { %p2440_p11 = por %p2439_p9, %p2438_p7 }
 0xc01   : > { %p2441_p13 = pnand %p2440_p11, %p2434_p1 }
 0xc6a   : > { %v1435_v19 = vpop.xlane.xlu0 %1434 }
 0xc6b   : > { %2347 = vrcp.f32 %v1435_v19 }
 0xc6e   : > { %v1453_v20 = vpop.permute.xlu0 %1452 }
 0xc6f   : > { %v1459_v21 = vsel %vm1020_vm7, %v1453_v20, 0 }
 0xc70   : > { %2134 = vmatpush3.bf16.msra.mxu1 %v1459_v21 }
 0xc71   : > { %2135 = vmatprep.subr.bf16.mxu1 %v2538_v12 }
 0xc72   : > { %v1356_v22 = vpop.permute.xlu0 %1355 }
 0xc73   : > { %1359 = vst.msk [vmem:[#allocation4] sm:$0xff] %vm1358_vm9, %v1356_v22 }
 0xc74   : > { %2136 = vmatpush3.bf16.msra.mxu1 %v1451_v15 }
 0xc75   : > { %2141 = vmatprep.subr.bf16.mxu1 %v2538_v12 }
 0xc78   : > { %v2348_v23 = vpop.eup %2347 }
 0xc79   : > { %v1437_v24 = vmul.f32 %v2348_v23, %v2346_v16 }
 0xc7b   : > { %v1438_v25 = vpack.c.bf16 %v1437_v24, %v1437_v24 }
 0xc7d   : > { %2138 = vmatmul.mubr.msk.bf16.vlgmr.msra.gmra.mxu1 %vm992_vm6, %v1438_v25 }
 0xc7e   : > { %2145 = vmatprep.mubr.msk.bf16.mxu1 %vm2539_vm3, %v2538_v12  ;;  %2142 = vmatpush3.bf16.msra.mxu1 %v2319_v26 }
 0xc7f   : > { %2143 = vmatprep.subr.bf16.mxu1 %v2538_v12 }
 0xc82   : > { %2144 = vmatpush3.bf16.msra.mxu1 %v2320_v27 }
 0xc83   : > { %2157 = vmatprep.subr.bf16.mxu1 %v2538_v12 }
 0xd3d   : > { %v1495_v28 = vpop.f32.mrf.mxu1 }
 0xd3e   : > { %1502 = vrot.lane.b32.xlu1 %v1495_v28, %s2545_s18  ;;  %s3112_s18 = sld [smem:[#allocation25_spill]] }
 0xd3f   : > { %v2139_v29 = vpop.f32.mrf.mxu1 }
 0xd41   : > { %v1498_v30 = vpop.f32.mrf.mxu1 }
 0xd43   : > { %v2140_v31 = vpop.f32.mrf.mxu1 }
 0xd44   : > { %v1984_v16 = vld [vmem:[%s3112_s18] ss:$0 sm:$0xff] }
 0xdb0   : > { %v1503_v33 = vpop.permute.xlu1 %1502 }
 0xdb1   : > { %1506 = vst.msk [vmem:[#allocation4] sm:$0xff] %vm1505_vm10, %v1503_v33 }
 0xdb8   : > { %v1507_v34 = vld [vmem:[#allocation4] sm:$0xff] }
 0xdb9   : > { %v1508_v35 = vpack.c.bf16 %v1507_v34, %v1507_v34 }
 0xdbb   : > { %2146 = vmatmul.mubr.msk.bf16.vlgmr.msra.gmra.mxu1 %vm828_vm2, %v1508_v35 }
 0xdbc   : > { %2173 = vmatprep.mubr.msk.bf16.mxu1 %vm2539_vm3, %v2538_v12 }
 0xe7b   : > { %v1569_v38 = vpop.f32.mrf.mxu1 }
 0xe7c   : > { %v1570_v39 = vadd.f32 %v1974_v37, %v1569_v38 }
 0xe7d   : > { %v2147_v40 = vpop.f32.mrf.mxu1 }
 0xe7e   : > { %v2951_v41 = vadd.f32 %v1570_v39, %v2814_v4  ;;  %v2323_v4 = vld [vmem:[%s3081_s14 + $0x38] sm:$0xff]  }
 0xe7f   : > { %v1572_v42 = vpop.f32.mrf.mxu1  ;;  %2158 = vmatpush3.bf16.msra.mxu1 %v2323_v4 }
 0xe80   : > { %v1578_v43 = vsel %vm828_vm2, %v2951_v41, 0.0  ;;  %2159 = vmatprep.subr.bf16.mxu1 %v2538_v12 }
 0xe81   : > { %1579 = vadd.xlane.f32.xlu0 %v1578_v43  ;;  %v2148_v44 = vpop.f32.mrf.mxu1 }
 0xe83   : > { %2160 = vmatpush3.bf16.msra.mxu1 %v2324_v52 }
 0xe84   : > { %2161 = vmatprep.subr.bf16.mxu1 %v2538_v12 }
 0xe87   : > { %2162 = vmatpush3.bf16.msra.mxu1 %v2325_v62 }
 0xe88   : > { %2163 = vmatprep.subr.bf16.mxu1 %v2538_v12 }
 0xe8b   : > { %2164 = vmatpush3.bf16.msra.mxu1 %v2326_v63 }
 0xe8c   : > { %2165 = vmatprep.subr.bf16.mxu1 %v2538_v12 }
 0xe8f   : > { %2166 = vmatpush3.bf16.msra.mxu1 %v2327_v0 }
 0xe90   : > { %2167 = vmatprep.subr.bf16.mxu1 %v2538_v12 }
 0xe93   : > { %2168 = vmatpush3.bf16.msra.mxu1 %v2328_v1 }
 0xe94   : > { %2169 = vmatprep.subr.bf16.mxu1 %v2538_v12 }
 0xe97   : > { %2170 = vmatpush3.bf16.msra.mxu1 %v2329_v2 }
 0xe98   : > { %2171 = vmatprep.subr.bf16.mxu1 %v2538_v12 }
 0xe9b   : > { %2172 = vmatpush3.bf16.msra.mxu1 %v2330_v3 }
 0xf0a   : > { %v1580_v45 = vpop.xlane.xlu0 %1579 }
 0xf0b   : > { %v1581_v46 = vmul.f32 0.03125, %v1580_v45 }
 0xf0d   : > { %v1582_v47 = vsub.f32 %v2951_v41, %v1581_v46 }
 0xf0f   : > { %v1583_v48 = vmul.f32 %v1582_v47, %v1582_v47 }
 0xf11   : > { %v1584_v49 = vsel %vm828_vm2, %v1583_v48, 0.0 }
 0xf12   : > { %1585 = vadd.xlane.f32.xlu1 %v1584_v49 }
 0xf9b   : > { %v1586_v53 = vpop.xlane.xlu1 %1585 }
 0xf9c   : > { %v1587_v32 = vmul.f32 0.03125, %v1586_v53 }
 0xf9e   : > { %v1588_v54 = vadd.f32 1e-05, %v1587_v32 }
 0xfa0   : > { %2349 = vrsqrt.f32 %v1588_v54 }
 0xfad   : > { %v2350_v55 = vpop.eup %2349 }
 0xfae   : > { %v1590_v57 = vmul.f32 %v2350_v55, %v1582_v47 }
 0xfb0   : > { %v1597_v59 = vmul.f32 %v1978_v56, %v1590_v57 }
 0xfb2   : > { %v1604_v60 = vadd.f32 %v1979_v58, %v1597_v59 }
 0xfb4   : > { %v1605_v61 = vpack.c.bf16 %v1604_v60, %v1604_v60 }
 0xfb6   : > { %2154 = vmatmul.mubr.msk.bf16.vlgmr.msra.gmra.mxu0 %vm828_vm2, %v1605_v61 }
0x1076   : > { %v1666_v6 = vpop.f32.mrf.mxu0 }
0x1077   : > { %v1667_v7 = vadd.f32 %v1980_v5, %v1666_v6 }
0x1078   : > { %v2155_v8 = vpop.f32.mrf.mxu0 }
0x1079   : > { %v1673_v9 = vmul.f32 0.70710677, %v1667_v7  ;;  %v1672_v13 = vmul.f32 0.5, %v1667_v7 }
0x107a   : > { %v1669_v10 = vpop.f32.mrf.mxu0 }
0x107b   : > { %2351 = verf.f32 %v1673_v9 }
0x107c   : > { %v2156_v11 = vpop.f32.mrf.mxu0 }
0x1088   : > { %v2352_v12 = vpop.eup %2351 }
0x1089   : > { %v1675_v14 = vadd.f32 1.0, %v2352_v12 }
0x108b   : > { %v1676_v15 = vmul.f32 %v1675_v14, %v1672_v13 }
0x108d   : > { %v1677_v36 = vpack.c.bf16 %v1676_v15, %v1676_v15 }
0x108f   : > { %2174 = vmatmul.mubr.bf16.vlgmr.msra.gmra.mxu1 %v1677_v36 }
0x114f   : > { %v1783_v17 = vpop.f32.mrf.mxu1 }
0x1150   : > { %v1784_v18 = vadd.f32 %v1984_v16, %v1783_v17 }
0x1151   : > { %v2175_v19 = vpop.f32.mrf.mxu1 }
0x1152   : > { %v1789_v20 = vadd.f32 %v1784_v18, %v2951_v41 }
0x1153   : > { %v1786_v21 = vpop.f32.mrf.mxu1 }
0x1154   : > { %1790 = vst.msk [vmem:[%s572_s23] sm:$0xff] %vm828_vm2, %v1789_v20 }
0x1155   : > { %v2176_v22 = vpop.f32.mrf.mxu1 }
0x1156   : > { %2444 = shalt.err (!%p2441_p13)
}
0x1157   : > { %s2445_s21 = scalar_lea.hbm %s3010_s16, 128  ;;  %s2449_s13 = scalar_lea.hbm %s3113_s15, 768 }
0x1158   : > { %p2446_p2 = scmp.ne.s32.totalorder %s3010_s16, %s2445_s21  ;;  %p2450_p6 = scmp.lt.s32.totalorder %s3010_s16, %s3113_s15 }
0x1159   : > { %p2451_p8 = scmp.lt.s32.totalorder %s2449_s13, %s2445_s21 }
0x115a   : > { %p2447_p5 = pnand %p2446_p2, %p2684_p3 }
0x115b   : > { %p2452_p10 = por %p2451_p8, %p2450_p6 }
0x115c   : > { %p2448_p4 = pneg %p2447_p5 }
0x115e   : > { %p2453_p12 = pnand %p2452_p10, %p2448_p4 }
0x1160   : > { %2456 = shalt.err (!%p2453_p12)
}
0x1161   : > { %2191 = dma.vmem_to_hbm [thread:$0]  (%p2684_p3), %s3012_s26, 128, %s3010_s16, %s1792_s25  }
0x1162 PF: > { %s3115_s24 = sld [smem:[#allocation15_spill]]  ;;  %p2213_p0 = scmp.ge.s32.totalorder %s2531_s28, 2 }
0x1163   : > { %s3116_s0 = sld [smem:[#allocation21_spill]] }
0x1168   : > { %s1819_s27 = sand.u32 1, %s3115_s24  }
0x1169   : > { %p3117_p1 = scmp.ne.s32.totalorder %s3116_s0, 0  ;;  %s1820_s30 = scalar_lea.sflag [#allocation7], %s1819_s27 }
0x116b   : > { %p2204_p7 = pnand %p2213_p0, %p3117_p1 }
0x116d   : > { %p2205_p9 = pneg %p2204_p7 }
0x116f   : > { %2498 = dma.done.wait (%p2205_p9), %s1820_s30, 128  }
0x1170   : > { %2500 = vsyncadd (%p2205_p9), %s1820_s30, 4294967168  ;;  %s31_s28 = sadd.s32 1, %s2531_s28   ;;  %s3118_s20 = sld [smem:[#allocation16_spill]] }
0x1171   : > { %p28_p11 = scmp.ge.s32.totalorder %s31_s28, 8   ;;  %s3119_s23 = sld [smem:[#allocation22_spill]] }
0x1172   : > { %s3120_s24 = sld [smem:[#allocation17_spill]]  ;;  %s3124_s21 = smov %s2507_s22 }
0x1173   : > { %s3121_s25 = sld [smem:[#allocation18_spill]]  ;;  %30 = sbr.rel (!%p28_p11) target bundleno = 12 (0xc), region = 137 }
0x1174   : > { %s3122_s26 = sld [smem:[#allocation19_spill]] }
0x1175   : > { %s3123_s27 = sld [smem:[#allocation20_spill]] }
0x1176   : > { %s3125_s22 = smov %s3118_s20 }
0x1178   :  { %1825 = vsyncpa [#allocation6], 1 }
0x1179   :  { %1827 = vsyncpa [#allocation6 + $0x1], 1 }
0x117a   :  { %1828 = vsyncpa [#allocation9], 1 }
0x117b   :  { %1829 = vsyncpa [#allocation7], 1 }
0x117c   :  { %1831 = vsyncpa [#allocation7 + $0x1], 1 }

</bundles_post_ra>
